<compile_context>
chip_gen: v7x
topology: tpu7x:2x2x1
jax: 0.10.0
libtpu: 0.0.40
codegen_flags: <defaults>
</compile_context>

<pallas_src>
import math
import functools

import jax
import jax.numpy as jnp
from jax.experimental import pallas as pl
from jax.experimental.pallas import tpu as pltpu

# ----------------------- model config (small, synthetic) -----------------------
LAYERS = 2
HEADS = 2
BATCH = 2
SEQ = 8          # content_window_size
VOCAB = 16
EMBED = 32
MAX_LENGTH = 500
VPAD = 128       # lane-dense logits slab (V padded to full 128-lane width)
BT = BATCH * SEQ

# Row offsets inside the packed (P32_ROWS, EMBED) parameter slab.  All matmul-weight
# blocks start at multiples of 8 so static row slices stay sublane-tile aligned.
EMB_OFF = 0                              # embedding table        (VOCAB rows)
PE_OFF = EMB_OFF + VOCAB                 # positional rows        (BT rows)
HW1_OFF = PE_OFF + BT                    # head Linear1 weight    (EMBED rows)
WFFN_OFF = HW1_OFF + EMBED               # per-layer FFN weights  (LAYERS*EMBED rows)
VEC_OFF = WFFN_OFF + LAYERS * EMBED      # per-layer vec rows     (4*LAYERS rows)
HB1_OFF = VEC_OFF + 4 * LAYERS           # head Linear1 bias      (1 row)
P32_ROWS = HB1_OFF + 1


# ----------------------------- Pallas kernel -----------------------------------
def transformer_kernel(tok_ref, p32_ref, wqkv_ref, h128_ref, out_ref, *,
                       layers, heads, batch, seq, embed, vocab):
    bt = batch * seq
    E = embed
    H = heads

    # ---- fused embedding gather (one-hot matmul on the MXU) + positional encoding
    tok = tok_ref[...]                                               # (BT, 1) int32
    onehot = (jax.lax.broadcasted_iota(jnp.int32, (bt, vocab), 1)
              == tok).astype(jnp.float32)                            # (BT, V)
    emb = p32_ref[EMB_OFF:EMB_OFF + vocab, :]                        # (V, E)
    pe = p32_ref[PE_OFF:PE_OFF + bt, :]                              # (BT, E)
    x = jnp.dot(onehot, emb, preferred_element_type=jnp.float32) + pe  # (BT, E)

    def layernorm(h, g, b, eps=1e-5):
        # var = E[h^2] - mu^2  -> the two lane reductions are independent
        mu = jnp.mean(h, axis=-1, keepdims=True)
        ms = jnp.mean(h * h, axis=-1, keepdims=True)
        var = ms - mu * mu
        return (h - mu) * jax.lax.rsqrt(var + eps) * g + b

    # additive causal mask, hoisted and pre-broadcast ONCE (no per-head re-broadcast)
    causal = (jax.lax.broadcasted_iota(jnp.int32, (seq, seq), 0)
              >= jax.lax.broadcasted_iota(jnp.int32, (seq, seq), 1))
    neg_mask = jnp.broadcast_to(
        jnp.where(causal, 0.0, -1e30).astype(jnp.float32)[None],
        (batch, seq, seq))                                           # (B, T, T)

    for li in range(layers):                 # static unroll (layers = 2)
        # per-layer weights: scale folded into Q columns, out-proj folded into V
        wqkv = wqkv_ref[li]                                          # (E, 3*H*E)
        wffn = p32_ref[WFFN_OFF + li * E:WFFN_OFF + (li + 1) * E, :]  # (E, E)
        vo = VEC_OFF + 4 * li
        ln_g = p32_ref[vo + 0:vo + 1, :]
        ln_b = p32_ref[vo + 1:vo + 2, :]
        b_proj = p32_ref[vo + 2:vo + 3, :]
        b_ffn = p32_ref[vo + 3:vo + 4, :]

        # x = norm(x)
        x = layernorm(x, ln_g, ln_b)

        # x = x + mha(x): one fused QKV matmul; per-head attention; output
        # projection is pre-folded into V so the head outputs are summed directly.
        qkv = jnp.dot(x, wqkv, preferred_element_type=jnp.float32)   # (BT, 3*H*E)
        mha = None
        for h in range(H):
            q = qkv[:, h * E:(h + 1) * E].reshape(batch, seq, E)
            k = qkv[:, (H + h) * E:(H + h + 1) * E].reshape(batch, seq, E)
            v = qkv[:, (2 * H + h) * E:(2 * H + h + 1) * E].reshape(batch, seq, E)
            s = jnp.einsum('bqe,bke->bqk', q, k,
                           preferred_element_type=jnp.float32) + neg_mask
            m = jnp.max(s, axis=-1, keepdims=True)
            p = jnp.exp(s - m)
            p = p * pl.reciprocal(jnp.sum(p, axis=-1, keepdims=True), approx=True)
            o = jnp.einsum('bqk,bke->bqe', p, v,
                           preferred_element_type=jnp.float32)       # (B, T, E)
            c = o.reshape(bt, E)
            mha = c if mha is None else mha + c
        x = x + mha + b_proj

        # x = norm(x)   (same LayerNorm parameters — module reuses self.norm)
        x = layernorm(x, ln_g, ln_b)

        # x = x + ffn(x)   (Linear + ReLU)
        ff = jnp.dot(x, wffn, preferred_element_type=jnp.float32) + b_ffn
        x = x + jnp.maximum(ff, 0.0)

    # final head: Linear(E,E) -> ReLU -> Linear(E, V padded to 128 lanes)
    hw1 = p32_ref[HW1_OFF:HW1_OFF + E, :]
    hb1 = p32_ref[HB1_OFF:HB1_OFF + 1, :]
    hw2 = h128_ref[0:E, :]
    hb2 = h128_ref[E:E + 1, :]
    h1 = jnp.maximum(
        jnp.dot(x, hw1, preferred_element_type=jnp.float32) + hb1, 0.0)
    logits = jnp.dot(h1, hw2, preferred_element_type=jnp.float32) + hb2
    out_ref[...] = logits.astype(out_ref.dtype)                      # (BT, VPAD)


def transformer_forward(tokens2d, params32, wqkv, head128):
    kernel = functools.partial(transformer_kernel, layers=LAYERS, heads=HEADS,
                               batch=BATCH, seq=SEQ, embed=EMBED, vocab=VOCAB)
    vmem = pl.BlockSpec(memory_space=pltpu.MemorySpace.VMEM)
    # Whole problem (<0.25 MiB) fits in VMEM on v5e/v6e/v7x; gridless single program.
    # TODO(synk): add a "parallel" batch grid axis only if the caller ever supplies
    # enough batch to give each v7x TensorCore several full (8,128) tiles of work.
    return pl.pallas_call(
        kernel,
        out_shape=jax.ShapeDtypeStruct((tokens2d.shape[0], VPAD), jnp.float32),
        in_specs=[vmem] * 4,
        out_specs=vmem,
    )(tokens2d, params32, wqkv, head128)


# ----------------------------- parameter setup ----------------------------------
def make_positional_encoding(max_length, embed):
    position = jnp.arange(max_length, dtype=jnp.float32)[:, None]
    div_term = jnp.exp(jnp.arange(0, embed, 2, dtype=jnp.float32)
                       * (-math.log(10000.0) / embed))
    pe = jnp.zeros((max_length, 1, embed), dtype=jnp.float32)
    pe = pe.at[:, 0, 0::2].set(jnp.sin(position * div_term))
    pe = pe.at[:, 0, 1::2].set(jnp.cos(position * div_term))
    return pe


def init_params(key):
    def nrm(k, shape, s=0.02):
        return (s * jax.random.normal(k, shape)).astype(jnp.float32)

    keys = jax.random.split(key, 3)
    embedding = nrm(keys[0], (VOCAB, EMBED), 1.0)

    scale = 1.0 / math.sqrt(EMBED)       # SDPA scale (full-E heads in the reference)
    lkeys = jax.random.split(keys[1], LAYERS)
    wqkv_l, wffn_l, vec_rows = [], [], []
    for li in range(LAYERS):
        lk = jax.random.split(lkeys[li], 7)
        wq = [nrm(k, (EMBED, EMBED)) for k in jax.random.split(lk[0], HEADS)]
        wk = [nrm(k, (EMBED, EMBED)) for k in jax.random.split(lk[1], HEADS)]
        wv = [nrm(k, (EMBED, EMBED)) for k in jax.random.split(lk[2], HEADS)]
        wproj = nrm(lk[3], (HEADS * EMBED, EMBED))      # mha output proj (in,out)
        b_proj = nrm(lk[4], (EMBED,))
        wffn_l.append(nrm(lk[5], (EMBED, EMBED)))       # block ffn (in,out)
        b_ffn = nrm(lk[6], (EMBED,))

        # Algebraic folds (exact up to f32 rounding):
        #   scale into Q:      s = (x Wq) (x Wk)^T * scale = (x (Wq*scale)) (x Wk)^T
        #   out-proj into V:   o_h Wproj_h = p_h (x Wv_h) Wproj_h = p_h (x Wv'_h)
        q_cols = [w * scale for w in wq]
        v_cols = [wv[h] @ wproj[h * EMBED:(h + 1) * EMBED, :] for h in range(HEADS)]
        wqkv_l.append(jnp.concatenate(q_cols + wk + v_cols, axis=1))  # (E, 3*H*E)

        vec_rows += [jnp.ones((EMBED,), jnp.float32),   # LayerNorm gamma
                     jnp.zeros((EMBED,), jnp.float32),  # LayerNorm beta
                     b_proj,                            # mha proj bias
                     b_ffn]                             # block ffn bias
    wqkv = jnp.stack(wqkv_l)                            # (L, E, 3*H*E)

    fk = jax.random.split(keys[2], 4)
    hw1 = nrm(fk[0], (EMBED, EMBED))                    # head Linear 1 (in,out)
    hb1 = nrm(fk[1], (EMBED,))
    w2 = nrm(fk[2], (EMBED, VOCAB))                     # head Linear 2 (in,out)
    b2 = nrm(fk[3], (VOCAB,))
    hw2p = jnp.zeros((EMBED, VPAD), jnp.float32).at[:, :VOCAB].set(w2)
    hb2p = jnp.zeros((1, VPAD), jnp.float32).at[:, :VOCAB].set(b2[None, :])
    head128 = jnp.concatenate([hw2p, hb2p], axis=0)     # (E+1, 128)

    # positional rows: pe[:B] (B,1,E) broadcast over T (reference quirk), flattened
    pe = make_positional_encoding(MAX_LENGTH, EMBED)
    pe_bt = jnp.broadcast_to(pe[:BATCH, 0, :][:, None, :],
                             (BATCH, SEQ, EMBED)).reshape(BT, EMBED)

    # static packed (P32_ROWS, E) parameter slab (built once; one DMA per call)
    params32 = jnp.concatenate(
        [embedding,                         # rows [EMB_OFF, PE_OFF)
         pe_bt,                             # rows [PE_OFF, HW1_OFF)
         hw1,                               # rows [HW1_OFF, WFFN_OFF)
         jnp.concatenate(wffn_l, axis=0),   # rows [WFFN_OFF, VEC_OFF)
         jnp.stack(vec_rows, axis=0),       # rows [VEC_OFF, HB1_OFF)
         hb1[None, :]],                     # row  HB1_OFF
        axis=0)
    assert params32.shape == (P32_ROWS, EMBED)
    return params32, wqkv, head128


def model_forward(tokens, params32, wqkv, head128):
    B, T = tokens.shape
    tokens2d = tokens.reshape(B * T, 1).astype(jnp.int32)
    out_pad = transformer_forward(tokens2d, params32, wqkv, head128)
    return out_pad[:, :VOCAB].reshape(B, T, VOCAB)


# ------------------------------------ main ---------------------------------------
if __name__ == "__main__":
    key = jax.random.PRNGKey(0)
    k_tok, k_par = jax.random.split(key)

    tokens = jax.random.randint(k_tok, (BATCH, SEQ), 0, VOCAB, dtype=jnp.int32)
    params32, wqkv, head128 = init_params(k_par)

    logits = model_forward(tokens, params32, wqkv, head128)
    logits = jax.block_until_ready(logits)

    assert logits.shape == (BATCH, SEQ, VOCAB)
    assert bool(jnp.all(jnp.isfinite(logits)))
    print("KERNEL_OK")
</pallas_src>

<mosaic_0001>
module attributes {stable_mosaic.version = 11 : i64} {
  func.func @transformer_kernel(%arg0: memref<16x1xi32, #tpu.memory_space<vmem>>, %arg1: memref<137x32xf32, #tpu.memory_space<vmem>>, %arg2: memref<2x32x192xf32, #tpu.memory_space<vmem>>, %arg3: memref<33x128xf32, #tpu.memory_space<vmem>>, %arg4: memref<16x128xf32, #tpu.memory_space<vmem>>) attributes {dimension_semantics = [], scalar_prefetch = 0 : i64, scratch_operands = 0 : i64, tpu.core_type = #tpu.core_type<tc>} {
    %c0 = arith.constant 0 : index
    %c0_0 = arith.constant 0 : index
    %0 = vector.load %arg0[%c0, %c0_0] : memref<16x1xi32, #tpu.memory_space<vmem>>, vector<16x1xi32>
    %1 = tpu.iota {dimensions = array<i32: 1>} : vector<16x16xi32>
    %2 = vector.broadcast %0 : vector<16x1xi32> to vector<16x16xi32>
    %3 = arith.cmpi eq, %1, %2 : vector<16x16xi32>
    %4 = arith.extui %3 : vector<16x16xi1> to vector<16x16xi32>
    %5 = arith.sitofp %4 : vector<16x16xi32> to vector<16x16xf32>
    %c0_1 = arith.constant 0 : index
    %c0_2 = arith.constant 0 : index
    %6 = vector.load %arg1[%c0_1, %c0_2] : memref<137x32xf32, #tpu.memory_space<vmem>>, vector<16x32xf32>
    %c16 = arith.constant 16 : index
    %c0_3 = arith.constant 0 : index
    %7 = vector.load %arg1[%c16, %c0_3] : memref<137x32xf32, #tpu.memory_space<vmem>>, vector<16x32xf32>
    %cst = arith.constant dense<0.000000e+00> : vector<16x32xf32>
    %8 = tpu.matmul %5, %6, %cst {dimension_numbers = #tpu.dot_dimension_numbers<[1], [0], [0], [1], [0, 0, 1, 1], [], []>} : vector<16x16xf32>, vector<16x32xf32>, vector<16x32xf32> -> vector<16x32xf32>
    %9 = arith.addf %8, %7 : vector<16x32xf32>
    %10 = tpu.iota {dimensions = array<i32: 0>} : vector<8x8xi32>
    %11 = tpu.iota {dimensions = array<i32: 1>} : vector<8x8xi32>
    %12 = arith.cmpi sge, %10, %11 : vector<8x8xi32>
    %cst_4 = arith.constant 0.000000e+00 : f32
    %cst_5 = arith.constant -1.000000e+30 : f32
    %13 = vector.broadcast %cst_4 : f32 to vector<8x8xf32>
    %14 = vector.broadcast %cst_5 : f32 to vector<8x8xf32>
    %15 = arith.select %12, %13, %14 : vector<8x8xi1>, vector<8x8xf32>
    %16 = vector.shape_cast %15 : vector<8x8xf32> to vector<1x8x8xf32>
    %17 = vector.shape_cast %16 : vector<1x8x8xf32> to vector<1x8x8xf32>
    %18 = vector.broadcast %17 : vector<1x8x8xf32> to vector<2x8x8xf32>
    %c0_6 = arith.constant 0 : index
    %c0_7 = arith.constant 0 : index
    %c0_8 = arith.constant 0 : index
    %19 = vector.load %arg2[%c0_6, %c0_7, %c0_8] : memref<2x32x192xf32, #tpu.memory_space<vmem>>, vector<1x32x192xf32>
    %20 = vector.shape_cast %19 : vector<1x32x192xf32> to vector<32x192xf32>
    %c64 = arith.constant 64 : index
    %c0_9 = arith.constant 0 : index
    %21 = vector.load %arg1[%c64, %c0_9] : memref<137x32xf32, #tpu.memory_space<vmem>>, vector<32x32xf32>
    %c128 = arith.constant 128 : index
    %c0_10 = arith.constant 0 : index
    %22 = vector.load %arg1[%c128, %c0_10] : memref<137x32xf32, #tpu.memory_space<vmem>>, vector<1x32xf32>
    %c129 = arith.constant 129 : index
    %c0_11 = arith.constant 0 : index
    %23 = vector.load %arg1[%c129, %c0_11] : memref<137x32xf32, #tpu.memory_space<vmem>>, vector<1x32xf32>
    %c130 = arith.constant 130 : index
    %c0_12 = arith.constant 0 : index
    %24 = vector.load %arg1[%c130, %c0_12] : memref<137x32xf32, #tpu.memory_space<vmem>>, vector<1x32xf32>
    %c131 = arith.constant 131 : index
    %c0_13 = arith.constant 0 : index
    %25 = vector.load %arg1[%c131, %c0_13] : memref<137x32xf32, #tpu.memory_space<vmem>>, vector<1x32xf32>
    %cst_14 = arith.constant dense<0.000000e+00> : vector<16xf32>
    %26 = vector.multi_reduction <add>, %9, %cst_14 [1] : vector<16x32xf32> to vector<16xf32>
    %27 = vector.shape_cast %26 : vector<16xf32> to vector<16x1xf32>
    %cst_15 = arith.constant 3.200000e+01 : f32
    %28 = vector.broadcast %cst_15 : f32 to vector<16x1xf32>
    %29 = arith.divf %27, %28 : vector<16x1xf32>
    %30 = arith.mulf %9, %9 : vector<16x32xf32>
    %cst_16 = arith.constant dense<0.000000e+00> : vector<16xf32>
    %31 = vector.multi_reduction <add>, %30, %cst_16 [1] : vector<16x32xf32> to vector<16xf32>
    %32 = vector.shape_cast %31 : vector<16xf32> to vector<16x1xf32>
    %cst_17 = arith.constant 3.200000e+01 : f32
    %33 = vector.broadcast %cst_17 : f32 to vector<16x1xf32>
    %34 = arith.divf %32, %33 : vector<16x1xf32>
    %35 = arith.mulf %29, %29 : vector<16x1xf32>
    %36 = arith.subf %34, %35 : vector<16x1xf32>
    %37 = vector.broadcast %29 : vector<16x1xf32> to vector<16x32xf32>
    %38 = arith.subf %9, %37 : vector<16x32xf32>
    %cst_18 = arith.constant 9.99999974E-6 : f32
    %39 = vector.broadcast %cst_18 : f32 to vector<16x1xf32>
    %40 = arith.addf %36, %39 : vector<16x1xf32>
    %41 = math.rsqrt %40 : vector<16x1xf32>
    %42 = vector.broadcast %41 : vector<16x1xf32> to vector<16x32xf32>
    %43 = arith.mulf %38, %42 : vector<16x32xf32>
    %44 = vector.broadcast %22 : vector<1x32xf32> to vector<16x32xf32>
    %45 = arith.mulf %43, %44 : vector<16x32xf32>
    %46 = vector.broadcast %23 : vector<1x32xf32> to vector<16x32xf32>
    %47 = arith.addf %45, %46 : vector<16x32xf32>
    %cst_19 = arith.constant dense<0.000000e+00> : vector<16x192xf32>
    %48 = tpu.matmul %47, %20, %cst_19 {dimension_numbers = #tpu.dot_dimension_numbers<[1], [0], [0], [1], [0, 0, 1, 1], [], []>} : vector<16x32xf32>, vector<32x192xf32>, vector<16x192xf32> -> vector<16x192xf32>
    %49 = vector.extract_strided_slice %48 {offsets = [0, 0], sizes = [16, 32], strides = [1, 1]} : vector<16x192xf32> to vector<16x32xf32>
    %50 = vector.shape_cast %49 : vector<16x32xf32> to vector<2x8x32xf32>
    %51 = vector.extract_strided_slice %48 {offsets = [0, 64], sizes = [16, 32], strides = [1, 1]} : vector<16x192xf32> to vector<16x32xf32>
    %52 = vector.shape_cast %51 : vector<16x32xf32> to vector<2x8x32xf32>
    %53 = vector.extract_strided_slice %48 {offsets = [0, 128], sizes = [16, 32], strides = [1, 1]} : vector<16x192xf32> to vector<16x32xf32>
    %54 = vector.shape_cast %53 : vector<16x32xf32> to vector<2x8x32xf32>
    "tpu.trace_start"() <{level = 10 : i32, message = "bqe,bke->bqk"}> : () -> ()
    %cst_20 = arith.constant dense<0.000000e+00> : vector<2x8x8xf32>
    %55 = tpu.matmul %50, %52, %cst_20 {dimension_numbers = #tpu.dot_dimension_numbers<[2], [2], [1], [1], [0, 0, 0, 1, 1, 1], [0], [0]>} : vector<2x8x32xf32>, vector<2x8x32xf32>, vector<2x8x8xf32> -> vector<2x8x8xf32>
    "tpu.trace_stop"() : () -> ()
    %56 = arith.addf %55, %18 : vector<2x8x8xf32>
    %cst_21 = arith.constant dense<0xFF800000> : vector<2x8xf32>
    %57 = vector.multi_reduction <maximumf>, %56, %cst_21 [2] : vector<2x8x8xf32> to vector<2x8xf32>
    %58 = vector.shape_cast %57 : vector<2x8xf32> to vector<2x8x1xf32>
    %59 = vector.broadcast %58 : vector<2x8x1xf32> to vector<2x8x8xf32>
    %60 = arith.subf %56, %59 : vector<2x8x8xf32>
    %61 = math.exp %60 : vector<2x8x8xf32>
    %cst_22 = arith.constant dense<0.000000e+00> : vector<2x8xf32>
    %62 = vector.multi_reduction <add>, %61, %cst_22 [2] : vector<2x8x8xf32> to vector<2x8xf32>
    %63 = vector.shape_cast %62 : vector<2x8xf32> to vector<2x8x1xf32>
    %64 = tpu.reciprocal %63 {approx = true} : vector<2x8x1xf32> -> vector<2x8x1xf32>
    %65 = vector.broadcast %64 : vector<2x8x1xf32> to vector<2x8x8xf32>
    %66 = arith.mulf %61, %65 : vector<2x8x8xf32>
    "tpu.trace_start"() <{level = 10 : i32, message = "bqk,bke->bqe"}> : () -> ()
    %cst_23 = arith.constant dense<0.000000e+00> : vector<2x8x32xf32>
    %67 = tpu.matmul %66, %54, %cst_23 {dimension_numbers = #tpu.dot_dimension_numbers<[2], [1], [1], [2], [0, 0, 0, 1, 1, 2], [0], [0]>} : vector<2x8x8xf32>, vector<2x8x32xf32>, vector<2x8x32xf32> -> vector<2x8x32xf32>
    "tpu.trace_stop"() : () -> ()
    %68 = vector.shape_cast %67 : vector<2x8x32xf32> to vector<16x32xf32>
    %69 = vector.extract_strided_slice %48 {offsets = [0, 32], sizes = [16, 32], strides = [1, 1]} : vector<16x192xf32> to vector<16x32xf32>
    %70 = vector.shape_cast %69 : vector<16x32xf32> to vector<2x8x32xf32>
    %71 = vector.extract_strided_slice %48 {offsets = [0, 96], sizes = [16, 32], strides = [1, 1]} : vector<16x192xf32> to vector<16x32xf32>
    %72 = vector.shape_cast %71 : vector<16x32xf32> to vector<2x8x32xf32>
    %73 = vector.extract_strided_slice %48 {offsets = [0, 160], sizes = [16, 32], strides = [1, 1]} : vector<16x192xf32> to vector<16x32xf32>
    %74 = vector.shape_cast %73 : vector<16x32xf32> to vector<2x8x32xf32>
    "tpu.trace_start"() <{level = 10 : i32, message = "bqe,bke->bqk"}> : () -> ()
    %cst_24 = arith.constant dense<0.000000e+00> : vector<2x8x8xf32>
    %75 = tpu.matmul %70, %72, %cst_24 {dimension_numbers = #tpu.dot_dimension_numbers<[2], [2], [1], [1], [0, 0, 0, 1, 1, 1], [0], [0]>} : vector<2x8x32xf32>, vector<2x8x32xf32>, vector<2x8x8xf32> -> vector<2x8x8xf32>
    "tpu.trace_stop"() : () -> ()
    %76 = arith.addf %75, %18 : vector<2x8x8xf32>
    %cst_25 = arith.constant dense<0xFF800000> : vector<2x8xf32>
    %77 = vector.multi_reduction <maximumf>, %76, %cst_25 [2] : vector<2x8x8xf32> to vector<2x8xf32>
    %78 = vector.shape_cast %77 : vector<2x8xf32> to vector<2x8x1xf32>
    %79 = vector.broadcast %78 : vector<2x8x1xf32> to vector<2x8x8xf32>
    %80 = arith.subf %76, %79 : vector<2x8x8xf32>
    %81 = math.exp %80 : vector<2x8x8xf32>
    %cst_26 = arith.constant dense<0.000000e+00> : vector<2x8xf32>
    %82 = vector.multi_reduction <add>, %81, %cst_26 [2] : vector<2x8x8xf32> to vector<2x8xf32>
    %83 = vector.shape_cast %82 : vector<2x8xf32> to vector<2x8x1xf32>
    %84 = tpu.reciprocal %83 {approx = true} : vector<2x8x1xf32> -> vector<2x8x1xf32>
    %85 = vector.broadcast %84 : vector<2x8x1xf32> to vector<2x8x8xf32>
    %86 = arith.mulf %81, %85 : vector<2x8x8xf32>
    "tpu.trace_start"() <{level = 10 : i32, message = "bqk,bke->bqe"}> : () -> ()
    %cst_27 = arith.constant dense<0.000000e+00> : vector<2x8x32xf32>
    %87 = tpu.matmul %86, %74, %cst_27 {dimension_numbers = #tpu.dot_dimension_numbers<[2], [1], [1], [2], [0, 0, 0, 1, 1, 2], [0], [0]>} : vector<2x8x8xf32>, vector<2x8x32xf32>, vector<2x8x32xf32> -> vector<2x8x32xf32>
    "tpu.trace_stop"() : () -> ()
    %88 = vector.shape_cast %87 : vector<2x8x32xf32> to vector<16x32xf32>
    %89 = arith.addf %68, %88 : vector<16x32xf32>
    %90 = arith.addf %47, %89 : vector<16x32xf32>
    %91 = vector.broadcast %24 : vector<1x32xf32> to vector<16x32xf32>
    %92 = arith.addf %90, %91 : vector<16x32xf32>
    %cst_28 = arith.constant dense<0.000000e+00> : vector<16xf32>
    %93 = vector.multi_reduction <add>, %92, %cst_28 [1] : vector<16x32xf32> to vector<16xf32>
    %94 = vector.shape_cast %93 : vector<16xf32> to vector<16x1xf32>
    %cst_29 = arith.constant 3.200000e+01 : f32
    %95 = vector.broadcast %cst_29 : f32 to vector<16x1xf32>
    %96 = arith.divf %94, %95 : vector<16x1xf32>
    %97 = arith.mulf %92, %92 : vector<16x32xf32>
    %cst_30 = arith.constant dense<0.000000e+00> : vector<16xf32>
    %98 = vector.multi_reduction <add>, %97, %cst_30 [1] : vector<16x32xf32> to vector<16xf32>
    %99 = vector.shape_cast %98 : vector<16xf32> to vector<16x1xf32>
    %cst_31 = arith.constant 3.200000e+01 : f32
    %100 = vector.broadcast %cst_31 : f32 to vector<16x1xf32>
    %101 = arith.divf %99, %100 : vector<16x1xf32>
    %102 = arith.mulf %96, %96 : vector<16x1xf32>
    %103 = arith.subf %101, %102 : vector<16x1xf32>
    %104 = vector.broadcast %96 : vector<16x1xf32> to vector<16x32xf32>
    %105 = arith.subf %92, %104 : vector<16x32xf32>
    %cst_32 = arith.constant 9.99999974E-6 : f32
    %106 = vector.broadcast %cst_32 : f32 to vector<16x1xf32>
    %107 = arith.addf %103, %106 : vector<16x1xf32>
    %108 = math.rsqrt %107 : vector<16x1xf32>
    %109 = vector.broadcast %108 : vector<16x1xf32> to vector<16x32xf32>
    %110 = arith.mulf %105, %109 : vector<16x32xf32>
    %111 = vector.broadcast %22 : vector<1x32xf32> to vector<16x32xf32>
    %112 = arith.mulf %110, %111 : vector<16x32xf32>
    %113 = vector.broadcast %23 : vector<1x32xf32> to vector<16x32xf32>
    %114 = arith.addf %112, %113 : vector<16x32xf32>
    %cst_33 = arith.constant dense<0.000000e+00> : vector<16x32xf32>
    %115 = tpu.matmul %114, %21, %cst_33 {dimension_numbers = #tpu.dot_dimension_numbers<[1], [0], [0], [1], [0, 0, 1, 1], [], []>} : vector<16x32xf32>, vector<32x32xf32>, vector<16x32xf32> -> vector<16x32xf32>
    %116 = vector.broadcast %25 : vector<1x32xf32> to vector<16x32xf32>
    %117 = arith.addf %115, %116 : vector<16x32xf32>
    %cst_34 = arith.constant 0.000000e+00 : f32
    %118 = vector.broadcast %cst_34 : f32 to vector<16x32xf32>
    %119 = arith.maximumf %117, %118 : vector<16x32xf32>
    %120 = arith.addf %114, %119 : vector<16x32xf32>
    %c1 = arith.constant 1 : index
    %c0_35 = arith.constant 0 : index
    %c0_36 = arith.constant 0 : index
    %121 = vector.load %arg2[%c1, %c0_35, %c0_36] : memref<2x32x192xf32, #tpu.memory_space<vmem>>, vector<1x32x192xf32>
    %122 = vector.shape_cast %121 : vector<1x32x192xf32> to vector<32x192xf32>
    %c96 = arith.constant 96 : index
    %c0_37 = arith.constant 0 : index
    %123 = vector.load %arg1[%c96, %c0_37] : memref<137x32xf32, #tpu.memory_space<vmem>>, vector<32x32xf32>
    %c132 = arith.constant 132 : index
    %c0_38 = arith.constant 0 : index
    %124 = vector.load %arg1[%c132, %c0_38] : memref<137x32xf32, #tpu.memory_space<vmem>>, vector<1x32xf32>
    %c133 = arith.constant 133 : index
    %c0_39 = arith.constant 0 : index
    %125 = vector.load %arg1[%c133, %c0_39] : memref<137x32xf32, #tpu.memory_space<vmem>>, vector<1x32xf32>
    %c134 = arith.constant 134 : index
    %c0_40 = arith.constant 0 : index
    %126 = vector.load %arg1[%c134, %c0_40] : memref<137x32xf32, #tpu.memory_space<vmem>>, vector<1x32xf32>
    %c135 = arith.constant 135 : index
    %c0_41 = arith.constant 0 : index
    %127 = vector.load %arg1[%c135, %c0_41] : memref<137x32xf32, #tpu.memory_space<vmem>>, vector<1x32xf32>
    %cst_42 = arith.constant dense<0.000000e+00> : vector<16xf32>
    %128 = vector.multi_reduction <add>, %120, %cst_42 [1] : vector<16x32xf32> to vector<16xf32>
    %129 = vector.shape_cast %128 : vector<16xf32> to vector<16x1xf32>
    %cst_43 = arith.constant 3.200000e+01 : f32
    %130 = vector.broadcast %cst_43 : f32 to vector<16x1xf32>
    %131 = arith.divf %129, %130 : vector<16x1xf32>
    %132 = arith.mulf %120, %120 : vector<16x32xf32>
    %cst_44 = arith.constant dense<0.000000e+00> : vector<16xf32>
    %133 = vector.multi_reduction <add>, %132, %cst_44 [1] : vector<16x32xf32> to vector<16xf32>
    %134 = vector.shape_cast %133 : vector<16xf32> to vector<16x1xf32>
    %cst_45 = arith.constant 3.200000e+01 : f32
    %135 = vector.broadcast %cst_45 : f32 to vector<16x1xf32>
    %136 = arith.divf %134, %135 : vector<16x1xf32>
    %137 = arith.mulf %131, %131 : vector<16x1xf32>
    %138 = arith.subf %136, %137 : vector<16x1xf32>
    %139 = vector.broadcast %131 : vector<16x1xf32> to vector<16x32xf32>
    %140 = arith.subf %120, %139 : vector<16x32xf32>
    %cst_46 = arith.constant 9.99999974E-6 : f32
    %141 = vector.broadcast %cst_46 : f32 to vector<16x1xf32>
    %142 = arith.addf %138, %141 : vector<16x1xf32>
    %143 = math.rsqrt %142 : vector<16x1xf32>
    %144 = vector.broadcast %143 : vector<16x1xf32> to vector<16x32xf32>
    %145 = arith.mulf %140, %144 : vector<16x32xf32>
    %146 = vector.broadcast %124 : vector<1x32xf32> to vector<16x32xf32>
    %147 = arith.mulf %145, %146 : vector<16x32xf32>
    %148 = vector.broadcast %125 : vector<1x32xf32> to vector<16x32xf32>
    %149 = arith.addf %147, %148 : vector<16x32xf32>
    %cst_47 = arith.constant dense<0.000000e+00> : vector<16x192xf32>
    %150 = tpu.matmul %149, %122, %cst_47 {dimension_numbers = #tpu.dot_dimension_numbers<[1], [0], [0], [1], [0, 0, 1, 1], [], []>} : vector<16x32xf32>, vector<32x192xf32>, vector<16x192xf32> -> vector<16x192xf32>
    %151 = vector.extract_strided_slice %150 {offsets = [0, 0], sizes = [16, 32], strides = [1, 1]} : vector<16x192xf32> to vector<16x32xf32>
    %152 = vector.shape_cast %151 : vector<16x32xf32> to vector<2x8x32xf32>
    %153 = vector.extract_strided_slice %150 {offsets = [0, 64], sizes = [16, 32], strides = [1, 1]} : vector<16x192xf32> to vector<16x32xf32>
    %154 = vector.shape_cast %153 : vector<16x32xf32> to vector<2x8x32xf32>
    %155 = vector.extract_strided_slice %150 {offsets = [0, 128], sizes = [16, 32], strides = [1, 1]} : vector<16x192xf32> to vector<16x32xf32>
    %156 = vector.shape_cast %155 : vector<16x32xf32> to vector<2x8x32xf32>
    "tpu.trace_start"() <{level = 10 : i32, message = "bqe,bke->bqk"}> : () -> ()
    %cst_48 = arith.constant dense<0.000000e+00> : vector<2x8x8xf32>
    %157 = tpu.matmul %152, %154, %cst_48 {dimension_numbers = #tpu.dot_dimension_numbers<[2], [2], [1], [1], [0, 0, 0, 1, 1, 1], [0], [0]>} : vector<2x8x32xf32>, vector<2x8x32xf32>, vector<2x8x8xf32> -> vector<2x8x8xf32>
    "tpu.trace_stop"() : () -> ()
    %158 = arith.addf %157, %18 : vector<2x8x8xf32>
    %cst_49 = arith.constant dense<0xFF800000> : vector<2x8xf32>
    %159 = vector.multi_reduction <maximumf>, %158, %cst_49 [2] : vector<2x8x8xf32> to vector<2x8xf32>
    %160 = vector.shape_cast %159 : vector<2x8xf32> to vector<2x8x1xf32>
    %161 = vector.broadcast %160 : vector<2x8x1xf32> to vector<2x8x8xf32>
    %162 = arith.subf %158, %161 : vector<2x8x8xf32>
    %163 = math.exp %162 : vector<2x8x8xf32>
    %cst_50 = arith.constant dense<0.000000e+00> : vector<2x8xf32>
    %164 = vector.multi_reduction <add>, %163, %cst_50 [2] : vector<2x8x8xf32> to vector<2x8xf32>
    %165 = vector.shape_cast %164 : vector<2x8xf32> to vector<2x8x1xf32>
    %166 = tpu.reciprocal %165 {approx = true} : vector<2x8x1xf32> -> vector<2x8x1xf32>
    %167 = vector.broadcast %166 : vector<2x8x1xf32> to vector<2x8x8xf32>
    %168 = arith.mulf %163, %167 : vector<2x8x8xf32>
    "tpu.trace_start"() <{level = 10 : i32, message = "bqk,bke->bqe"}> : () -> ()
    %cst_51 = arith.constant dense<0.000000e+00> : vector<2x8x32xf32>
    %169 = tpu.matmul %168, %156, %cst_51 {dimension_numbers = #tpu.dot_dimension_numbers<[2], [1], [1], [2], [0, 0, 0, 1, 1, 2], [0], [0]>} : vector<2x8x8xf32>, vector<2x8x32xf32>, vector<2x8x32xf32> -> vector<2x8x32xf32>
    "tpu.trace_stop"() : () -> ()
    %170 = vector.shape_cast %169 : vector<2x8x32xf32> to vector<16x32xf32>
    %171 = vector.extract_strided_slice %150 {offsets = [0, 32], sizes = [16, 32], strides = [1, 1]} : vector<16x192xf32> to vector<16x32xf32>
    %172 = vector.shape_cast %171 : vector<16x32xf32> to vector<2x8x32xf32>
    %173 = vector.extract_strided_slice %150 {offsets = [0, 96], sizes = [16, 32], strides = [1, 1]} : vector<16x192xf32> to vector<16x32xf32>
    %174 = vector.shape_cast %173 : vector<16x32xf32> to vector<2x8x32xf32>
    %175 = vector.extract_strided_slice %150 {offsets = [0, 160], sizes = [16, 32], strides = [1, 1]} : vector<16x192xf32> to vector<16x32xf32>
    %176 = vector.shape_cast %175 : vector<16x32xf32> to vector<2x8x32xf32>
    "tpu.trace_start"() <{level = 10 : i32, message = "bqe,bke->bqk"}> : () -> ()
    %cst_52 = arith.constant dense<0.000000e+00> : vector<2x8x8xf32>
    %177 = tpu.matmul %172, %174, %cst_52 {dimension_numbers = #tpu.dot_dimension_numbers<[2], [2], [1], [1], [0, 0, 0, 1, 1, 1], [0], [0]>} : vector<2x8x32xf32>, vector<2x8x32xf32>, vector<2x8x8xf32> -> vector<2x8x8xf32>
    "tpu.trace_stop"() : () -> ()
    %178 = arith.addf %177, %18 : vector<2x8x8xf32>
    %cst_53 = arith.constant dense<0xFF800000> : vector<2x8xf32>
    %179 = vector.multi_reduction <maximumf>, %178, %cst_53 [2] : vector<2x8x8xf32> to vector<2x8xf32>
    %180 = vector.shape_cast %179 : vector<2x8xf32> to vector<2x8x1xf32>
    %181 = vector.broadcast %180 : vector<2x8x1xf32> to vector<2x8x8xf32>
    %182 = arith.subf %178, %181 : vector<2x8x8xf32>
    %183 = math.exp %182 : vector<2x8x8xf32>
    %cst_54 = arith.constant dense<0.000000e+00> : vector<2x8xf32>
    %184 = vector.multi_reduction <add>, %183, %cst_54 [2] : vector<2x8x8xf32> to vector<2x8xf32>
    %185 = vector.shape_cast %184 : vector<2x8xf32> to vector<2x8x1xf32>
    %186 = tpu.reciprocal %185 {approx = true} : vector<2x8x1xf32> -> vector<2x8x1xf32>
    %187 = vector.broadcast %186 : vector<2x8x1xf32> to vector<2x8x8xf32>
    %188 = arith.mulf %183, %187 : vector<2x8x8xf32>
    "tpu.trace_start"() <{level = 10 : i32, message = "bqk,bke->bqe"}> : () -> ()
    %cst_55 = arith.constant dense<0.000000e+00> : vector<2x8x32xf32>
    %189 = tpu.matmul %188, %176, %cst_55 {dimension_numbers = #tpu.dot_dimension_numbers<[2], [1], [1], [2], [0, 0, 0, 1, 1, 2], [0], [0]>} : vector<2x8x8xf32>, vector<2x8x32xf32>, vector<2x8x32xf32> -> vector<2x8x32xf32>
    "tpu.trace_stop"() : () -> ()
    %190 = vector.shape_cast %189 : vector<2x8x32xf32> to vector<16x32xf32>
    %191 = arith.addf %170, %190 : vector<16x32xf32>
    %192 = arith.addf %149, %191 : vector<16x32xf32>
    %193 = vector.broadcast %126 : vector<1x32xf32> to vector<16x32xf32>
    %194 = arith.addf %192, %193 : vector<16x32xf32>
    %cst_56 = arith.constant dense<0.000000e+00> : vector<16xf32>
    %195 = vector.multi_reduction <add>, %194, %cst_56 [1] : vector<16x32xf32> to vector<16xf32>
    %196 = vector.shape_cast %195 : vector<16xf32> to vector<16x1xf32>
    %cst_57 = arith.constant 3.200000e+01 : f32
    %197 = vector.broadcast %cst_57 : f32 to vector<16x1xf32>
    %198 = arith.divf %196, %197 : vector<16x1xf32>
    %199 = arith.mulf %194, %194 : vector<16x32xf32>
    %cst_58 = arith.constant dense<0.000000e+00> : vector<16xf32>
    %200 = vector.multi_reduction <add>, %199, %cst_58 [1] : vector<16x32xf32> to vector<16xf32>
    %201 = vector.shape_cast %200 : vector<16xf32> to vector<16x1xf32>
    %cst_59 = arith.constant 3.200000e+01 : f32
    %202 = vector.broadcast %cst_59 : f32 to vector<16x1xf32>
    %203 = arith.divf %201, %202 : vector<16x1xf32>
    %204 = arith.mulf %198, %198 : vector<16x1xf32>
    %205 = arith.subf %203, %204 : vector<16x1xf32>
    %206 = vector.broadcast %198 : vector<16x1xf32> to vector<16x32xf32>
    %207 = arith.subf %194, %206 : vector<16x32xf32>
    %cst_60 = arith.constant 9.99999974E-6 : f32
    %208 = vector.broadcast %cst_60 : f32 to vector<16x1xf32>
    %209 = arith.addf %205, %208 : vector<16x1xf32>
    %210 = math.rsqrt %209 : vector<16x1xf32>
    %211 = vector.broadcast %210 : vector<16x1xf32> to vector<16x32xf32>
    %212 = arith.mulf %207, %211 : vector<16x32xf32>
    %213 = vector.broadcast %124 : vector<1x32xf32> to vector<16x32xf32>
    %214 = arith.mulf %212, %213 : vector<16x32xf32>
    %215 = vector.broadcast %125 : vector<1x32xf32> to vector<16x32xf32>
    %216 = arith.addf %214, %215 : vector<16x32xf32>
    %cst_61 = arith.constant dense<0.000000e+00> : vector<16x32xf32>
    %217 = tpu.matmul %216, %123, %cst_61 {dimension_numbers = #tpu.dot_dimension_numbers<[1], [0], [0], [1], [0, 0, 1, 1], [], []>} : vector<16x32xf32>, vector<32x32xf32>, vector<16x32xf32> -> vector<16x32xf32>
    %218 = vector.broadcast %127 : vector<1x32xf32> to vector<16x32xf32>
    %219 = arith.addf %217, %218 : vector<16x32xf32>
    %cst_62 = arith.constant 0.000000e+00 : f32
    %220 = vector.broadcast %cst_62 : f32 to vector<16x32xf32>
    %221 = arith.maximumf %219, %220 : vector<16x32xf32>
    %222 = arith.addf %216, %221 : vector<16x32xf32>
    %c32 = arith.constant 32 : index
    %c0_63 = arith.constant 0 : index
    %223 = vector.load %arg1[%c32, %c0_63] : memref<137x32xf32, #tpu.memory_space<vmem>>, vector<32x32xf32>
    %c136 = arith.constant 136 : index
    %c0_64 = arith.constant 0 : index
    %224 = vector.load %arg1[%c136, %c0_64] : memref<137x32xf32, #tpu.memory_space<vmem>>, vector<1x32xf32>
    %c0_65 = arith.constant 0 : index
    %c0_66 = arith.constant 0 : index
    %225 = vector.load %arg3[%c0_65, %c0_66] : memref<33x128xf32, #tpu.memory_space<vmem>>, vector<32x128xf32>
    %c32_67 = arith.constant 32 : index
    %c0_68 = arith.constant 0 : index
    %226 = vector.load %arg3[%c32_67, %c0_68] : memref<33x128xf32, #tpu.memory_space<vmem>>, vector<1x128xf32>
    %cst_69 = arith.constant dense<0.000000e+00> : vector<16x32xf32>
    %227 = tpu.matmul %222, %223, %cst_69 {dimension_numbers = #tpu.dot_dimension_numbers<[1], [0], [0], [1], [0, 0, 1, 1], [], []>} : vector<16x32xf32>, vector<32x32xf32>, vector<16x32xf32> -> vector<16x32xf32>
    %228 = vector.broadcast %224 : vector<1x32xf32> to vector<16x32xf32>
    %229 = arith.addf %227, %228 : vector<16x32xf32>
    %cst_70 = arith.constant 0.000000e+00 : f32
    %230 = vector.broadcast %cst_70 : f32 to vector<16x32xf32>
    %231 = arith.maximumf %229, %230 : vector<16x32xf32>
    %cst_71 = arith.constant dense<0.000000e+00> : vector<16x128xf32>
    %232 = tpu.matmul %231, %225, %cst_71 {dimension_numbers = #tpu.dot_dimension_numbers<[1], [0], [0], [1], [0, 0, 1, 1], [], []>} : vector<16x32xf32>, vector<32x128xf32>, vector<16x128xf32> -> vector<16x128xf32>
    %233 = vector.broadcast %226 : vector<1x128xf32> to vector<16x128xf32>
    %234 = arith.addf %232, %233 : vector<16x128xf32>
    %c0_72 = arith.constant 0 : index
    %c0_73 = arith.constant 0 : index
    %235 = vector.load %arg4[%c0_72, %c0_73] : memref<16x128xf32, #tpu.memory_space<vmem>>, vector<16x128xf32>
    tpu.vector_store %arg4[%c0_72, %c0_73], %234 {strides = array<i32>} : memref<16x128xf32, #tpu.memory_space<vmem>>, vector<16x128xf32>,
    return
  }
}

</mosaic_0001>

<bundles_post_ra>
// kernel: tpu_custom_call.1
= control target key start
LH: loop header
LB: loop body
LE: loop exit
PB: predicated region body
PF: predicated region fallthrough
CT: control target
= control target key end

     0   :  { %v2568_v1 = vmov 0   ;;  %s2970_s0 = inlined_call_operand.vmem [shape: s32[16,1], index: 0, kind: input, shape index: {}]   ;;  %s2971_s1 = inlined_call_operand.vmem [shape: f32[137,32], index: 1, kind: input, shape index: {}]   ;;  %s2972_s2 = inlined_call_operand.vmem [shape: f32[2,32,192], index: 2, kind: input, shape index: {}]   ;;  %s2973_s3 = inlined_call_operand.vmem [shape: f32[33,128], index: 3, kind: input, shape index: {}]   ;;  %s2974_s4 = inlined_call_operand.hbm [shape: f32[16,128], index: 4, kind: output, shape index: {}]  }
   0x1   :  { %v18_v0 = vld [vmem:[%s2970_s0] sm:$0xff]  ;;  %2495 = vset.pattern.permute.xlu0 %v2568_v1  ;;  %v35_v3 = vld [vmem:[%s2971_s1 + $0x8] sm:$0xff] }
   0x2   :  { %v34_v2 = vld [vmem:[%s2971_s1] sm:$0xff] }
   0x3   :  { %9 = vsyncpa [#allocation3], 0  ;;  %23 = vperm.xlu0 %2495, %v18_v0   ;;  %v2433_v4 = vpack.c.bf16 %v35_v3, %v34_v2  ;;  %v19_v5 = vld [vmem:[%s2970_s0 + $0x8] sm:$0xff]  ;;  %v2569_v6 = vmov 0.0   ;;  %v20_v7 = vlaneseq  ;;  %vm38_vm0 = vcmask 130048   ;;  %v37_v13 = vld [vmem:[%s2971_s1 + $0x18] sm:$0xff] }
   0x4   :  { %254 = vmatprep.mubr.f32.mxu1 %v2569_v6  ;;  %v36_v14 = vld [vmem:[%s2971_s1 + $0x10] sm:$0xff]  ;;  %vm140_vm3 = vcmask 261120   ;;  %v125_v25 = vld [vmem:[%s2972_s2 + $0x8] sm:$0xff]  ;;  %v127_v26 = vld [vmem:[%s2972_s2 + $0x18] sm:$0xff]  ;;  %vm2570_vm4 = vmmov 0   ;;  %s2571_s20 = smov 64  }
   0x5   :  { %2434 = vmatprep.subr.bf16.mxu0 %v2433_v4  ;;  %v2618_v8 = vand.u32 127, %v20_v7  ;;  %v124_v27 = vld [vmem:[%s2972_s2] sm:$0xff]  ;;  %v2437_v28 = vpack.c.bf16 %v127_v26, %v125_v25  ;;  %v126_v29 = vld [vmem:[%s2972_s2 + $0x10] sm:$0xff]  ;;  %v129_v30 = vld [vmem:[%s2972_s2 + $0x28] sm:$0xff]  ;;  %vm421_vm6 = vcmask 64512   ;;  %s2573_s21 = smov 32  }
   0x6   :  { %2436 = vmatpush3.bf16.msra.mxu0 %v2433_v4  ;;  %v131_v31 = vld [vmem:[%s2972_s2 + $0x38] sm:$0xff]  ;;  %v2439_v32 = vpack.c.bf16 %v126_v29, %v124_v27  ;;  %v128_v34 = vld [vmem:[%s2972_s2 + $0x20] sm:$0xff]  ;;  %v130_v35 = vld [vmem:[%s2972_s2 + $0x30] sm:$0xff]  ;;  %s2574_s22 = smov 96   ;;  %s2575_s30 = smov [#allocation2]  }
   0x7   :  { %26 = vperm.xlu0 %2495, %v19_v5   ;;  %2309 = vmatprep.subr.mxu0 %v2569_v6  ;;  %v2441_v33 = vpack.c.bf16 %v131_v31, %v129_v30  ;;  %v2443_v36 = vpack.c.bf16 %v130_v35, %v128_v34  ;;  %v2662_v53 = vld [vmem:[%s2971_s1 + $0x80] ss:$0 sm:$0xff]  ;;  %v2667_v55 = vld [vmem:[%s2971_s1 + $0x81] ss:$0 sm:$0xff]  ;;  %v121_v5 = vshrl.u32 %v20_v7, 7  ;;  %s2173_s5 = sshll.u32 %s2575_s30, 4  ;;  %s2174_s5 = int_to_ptr.vmem [resolvable:$true] %s2173_s5 }
   0x8   :  { %2438 = vmatprep.subr.bf16.mxu1 %v2437_v28  ;;  %p2549_p1 = scmp.lt.s32.totalorder %s2174_s5, %s2174_s5 }
   0x9   :  { %2440 = vmatpush1.bf16.msra.mxu1 %v2439_v32  ;;  %vm122_vm5 = vcmp.ge.s32.totalorder %v121_v5, %v2618_v8 }
   0xa   :  { %2442 = vmatprep.subr.bf16.mxu1 %v2441_v33 }
   0xd   :  { %2444 = vmatpush1.bf16.msra.mxu1 %v2443_v36 }
   0xe   :  { %2324 = vmatprep.subr.mxu1 %v2569_v6 }
  0x82   :  { %v24_v9 = vpop.permute.xlu0 %23 }
  0x83   :  { %vm28_vm1 = vcmp.eq.s32.totalorder %v2618_v8, %v24_v9  ;;  %v2572_v9 = vmov -1e+30  }
  0x84   :  { %v2184_v10 = vsel %vm28_vm1, 1.0, %v2569_v6 }
  0x85   :  { %2306 = vmatprep.mubr.msk.f32.mxu0 %vm38_vm0, %v2184_v10  ;;  %v2708_v10 = vsel %vm122_vm5, 0.0, %v2572_v9 }
  0x86   :  { %v27_v11 = vpop.permute.xlu0 %26 }
  0x87   :  { %vm29_vm2 = vcmp.eq.s32.totalorder %v2618_v8, %v27_v11 }
  0x88   :  { %v2185_v12 = vsel %vm29_vm2, 1.0, %v2569_v6 }
  0x89   :  { %2307 = vmatmul.mubr.msk.f32.vlgmr.msra.gmra.mrb[0].mxu0 %vm38_vm0, %v2185_v12 }
  0x8a   :  { %2311 = vmatprep.mubr.msk.f32.mxu0 %vm2570_vm4, %v2569_v6 }
 0x15c   :  { %v2308_v15 = vpop.f32.mrb[0].mxu0 }
 0x15d   :  { %v117_v16 = vadd.f32 %v2308_v15, %v37_v13  ;;  %v111_v17 = vpop.f32.mrb[1].mxu0 }
 0x15e   :  { %v112_v18 = vadd.f32 %v111_v17, %v36_v14 }
 0x15f   :  { %v144_v19 = vsel %vm140_vm3, %v117_v16, 0.0  ;;  %v151_v23 = vmul.f32 %v117_v16, %v117_v16 }
 0x160   :  { %145 = vadd.xlane.f32.xlu0 %v144_v19  ;;  %v141_v20 = vsel %vm140_vm3, %v112_v18, 0.0  ;;  %v150_v21 = vmul.f32 %v112_v18, %v112_v18 }
 0x161   :  { %142 = vadd.xlane.f32.xlu1 %v141_v20  ;;  %v155_v24 = vsel %vm140_vm3, %v151_v23, 0.0 }
 0x162   :  { %v152_v22 = vsel %vm140_vm3, %v150_v21, 0.0 }
 0x165   :  { %153 = vadd.xlane.f32.xlu1 %v152_v22 }
 0x169   :  { %156 = vadd.xlane.f32.xlu1 %v155_v24 }
 0x1ed   :  { %v146_v39 = vpop.xlane.xlu0 %145 }
 0x1ee   :  { %v143_v37 = vpop.xlane.xlu1 %142  ;;  %v149_v41 = vmul.f32 0.03125, %v146_v39 }
 0x1ef   :  { %v148_v38 = vmul.f32 0.03125, %v143_v37 }
 0x1f0   :  { %v161_v46 = vmul.f32 %v149_v41, %v149_v41  ;;  %v165_v56 = vsub.f32 %v117_v16, %v149_v41 }
 0x1f1   :  { %v160_v42 = vmul.f32 %v148_v38, %v148_v38  ;;  %v164_v51 = vsub.f32 %v112_v18, %v148_v38 }
 0x1f2   :  { %v154_v40 = vpop.xlane.xlu1 %153 }
 0x1f3   :  { %v158_v43 = vmul.f32 0.03125, %v154_v40 }
 0x1f5   :  { %v162_v44 = vsub.f32 %v158_v43, %v160_v42 }
 0x1f6   :  { %v157_v45 = vpop.xlane.xlu1 %156 }
 0x1f7   :  { %v166_v47 = vadd.f32 1e-05, %v162_v44  ;;  %v159_v48 = vmul.f32 0.03125, %v157_v45 }
 0x1f9   :  { %2496 = vrsqrt.f32 %v166_v47  ;;  %v163_v49 = vsub.f32 %v159_v48, %v161_v46 }
 0x1fb   :  { %v167_v50 = vadd.f32 1e-05, %v163_v49 }
 0x1fd   :  { %2498 = vrsqrt.f32 %v167_v50 }
 0x203   :  { %v2497_v52 = vpop.eup %2496 }
 0x204   :  { %v170_v54 = vmul.f32 %v2497_v52, %v164_v51 }
 0x206   :  { %v176_v57 = vmul.f32 %v2662_v53, %v170_v54 }
 0x207   :  { %v2499_v58 = vpop.eup %2498 }
 0x208   :  { %v2671_v59 = vadd.f32 %v2667_v55, %v176_v57  ;;  %v171_v60 = vmul.f32 %v2499_v58, %v165_v56 }
 0x20a   :  { %2190 = vmatmul.mubr.msk.f32.vlgmr.msra.gmra.mrb[0].mxu1 %vm140_vm3, %v2671_v59  ;;  %v177_v61 = vmul.f32 %v2662_v53, %v171_v60 }
 0x20b   :  { %260 = vmatprep.mubr.f32.mxu1 %v2569_v6 }
 0x20c   :  { %v2678_v62 = vadd.f32 %v2667_v55, %v177_v61 }
 0x20e   :  { %2191 = vmatmul.mubr.msk.f32.gmra.mrb[2].mxu1 %vm140_vm3, %v2678_v62 }
 0x20f   :  { %2326 = vmatprep.mubr.msk.f32.mxu1 %vm2570_vm4, %v2569_v6 }
 0x2dd   :  { %v256_v63 = vpop.f32.mrb[0].mxu1 }
 0x2de   :  { %268 = vrot.lane.b32.xlu1 %v256_v63, %s2571_s20  ;;  %v2687_v0 = vpop.f32.mrb[1].mxu1 }
 0x2e1   :  { %v262_v1 = vpop.f32.mrb[2].mxu1 }
 0x2e2   :  { %345 = vrot.lane.b32.xlu1 %v262_v1, %s2571_s20  ;;  %v2690_v2 = vpop.f32.mrb[3].mxu1 }
 0x2e3   :  { %2325 = vmatpush3.msra.mxu1 %v2690_v2 }
 0x2e4   :  { %2334 = vmatprep.subr.mxu1 %v2569_v6 }
 0x350   :  { %v269_v3 = vpop.permute.xlu1 %268 }
 0x351   :  { %2310 = vmatpush3.xpose.msk.msra.mxu0 %vm140_vm3, %v269_v3 }
 0x352   :  { %2314 = vmatprep.subr.mxu0 %v2569_v6 }
 0x354   :  { %2312 = vmatmul.mubr.msk.f32.vlgmr.msra.gmra.mrb[2].mxu0 %vm140_vm3, %v256_v63  ;;  %v346_v4 = vpop.permute.xlu1 %345 }
 0x355   :  { %2315 = vmatpush3.xpose.msk.msra.mxu0 %vm140_vm3, %v346_v4  ;;  %2316 = vmatprep.mubr.msk.f32.mxu0 %vm2570_vm4, %v2569_v6 }
 0x356   :  { %2319 = vmatprep.subr.mxu0 %v2569_v6 }
 0x358   :  { %2317 = vmatmul.mubr.msk.f32.vlgmr.msra.gmra.mrb[4].mxu0 %vm140_vm3, %v262_v1 }
 0x359   :  { %2320 = vmatpush3.msra.mxu0 %v2687_v0  ;;  %2321 = vmatprep.mubr.msk.f32.mxu0 %vm2570_vm4, %v2569_v6 }
 0x35a   :  { %2329 = vmatprep.subr.mxu0 %v2569_v6 }
 0x427   :  { %v340_v11 = vpop.f32.mrb[2].mxu0 }
 0x428   :  { %v341_v12 = vadd.f32 %v340_v11, %v2708_v10  ;;  %v2313_v13 = vpop.f32.mrb[3].mxu0 }
 0x42a   :  { %v422_v14 = vsel %vm421_vm6, %v341_v12, -inf }
 0x42b   :  { %423 = vmax.xlane.f32.xlu1 %v422_v14  ;;  %v417_v15 = vpop.f32.mrb[4].mxu0 }
 0x42c   :  { %v418_v16 = vadd.f32 %v417_v15, %v2708_v10  ;;  %v2318_v17 = vpop.f32.mrb[5].mxu0 }
 0x42e   :  { %v425_v18 = vsel %vm421_vm6, %v418_v16, -inf }
 0x42f   :  { %426 = vmax.xlane.f32.xlu0 %v425_v18 }
 0x43c   :  { %670 = vrot.lane.b32.xlu1 %v262_v1, %s2573_s21 }
 0x445   :  { %592 = vrot.lane.b32.xlu0 %v256_v63, %s2573_s21 }
 0x449   :  { %590 = vrot.lane.b32.xlu0 %v256_v63, %s2574_s22 }
 0x4b8   :  { %v424_v7 = vpop.xlane.xlu1 %423 }
 0x4b9   :  { %v428_v8 = vsub.f32 %v341_v12, %v424_v7 }
 0x4bb   :  { %v430_v19 = vmul.f32 1.442695, %v428_v8 }
 0x4bc   :  { %v427_v20 = vpop.xlane.xlu0 %426  ;;  %v671_v35 = vpop.permute.xlu1 %670 }
 0x4bd   :  { %2500 = vpow2.f32 %v430_v19  ;;  %v429_v21 = vsub.f32 %v418_v16, %v427_v20 }
 0x4bf   :  { %v432_v22 = vmul.f32 1.442695, %v429_v21 }
 0x4c0   :  { %v593_v27 = vpop.permute.xlu0 %592 }
 0x4c1   :  { %2502 = vpow2.f32 %v432_v22 }
 0x4c4   :  { %v591_v28 = vpop.permute.xlu0 %590 }
 0x4c7   :  { %v2501_v23 = vpop.eup %2500 }
 0x4c8   :  { %v434_v24 = vsel %vm421_vm6, %v2501_v23, 0.0 }
 0x4c9   :  { %435 = vadd.xlane.f32.xlu0 %v434_v24 }
 0x4cb   :  { %v2503_v25 = vpop.eup %2502 }
 0x4cc   :  { %v437_v26 = vsel %vm421_vm6, %v2503_v25, 0.0 }
 0x4cd   :  { %438 = vadd.xlane.f32.xlu0 %v437_v26 }
 0x4e3   :  { %668 = vrot.lane.b32.xlu0 %v262_v1, %s2574_s22 }
 0x556   :  { %v436_v29 = vpop.xlane.xlu0 %435 }
 0x557   :  { %2504 = vrcp.f32 %v436_v29 }
 0x55a   :  { %v439_v30 = vpop.xlane.xlu0 %438 }
 0x55b   :  { %2506 = vrcp.f32 %v439_v30 }
 0x55e   :  { %v669_v36 = vpop.permute.xlu0 %668 }
 0x561   :  { %v2505_v31 = vpop.eup %2504 }
 0x562   :  { %v442_v32 = vmul.f32 %v2505_v31, %v2501_v23 }
 0x564   :  { %2322 = vmatmul.mubr.msk.f32.vlgmr.msra.gmra.mrb[6].mxu0 %vm421_vm6, %v442_v32 }
 0x565   :  { %v2507_v33 = vpop.eup %2506  ;;  %2330 = vmatpush3.xpose.msk.msra.mxu0 %vm140_vm3, %v593_v27  ;;  %2331 = vmatprep.mubr.msk.f32.mxu0 %vm2570_vm4, %v2569_v6  ;;  %v134_v27 = vld [vmem:[%s2971_s1 + $0x50] sm:$0xff] }
 0x566   :  { %v443_v34 = vmul.f32 %v2507_v33, %v2503_v25  ;;  %2339 = vmatprep.subr.mxu0 %v2569_v6  ;;  %v132_v25 = vld [vmem:[%s2971_s1 + $0x40] sm:$0xff] }
 0x568   :  { %2327 = vmatmul.mubr.msk.f32.vlgmr.msra.gmra.mrb[4].mxu1 %vm421_vm6, %v443_v34  ;;  %2332 = vmatmul.mubr.msk.f32.vlgmr.msra.gmra.mrb[8].mxu0 %vm140_vm3, %v591_v28  ;;  %v135_v28 = vld [vmem:[%s2971_s1 + $0x58] sm:$0xff] }
 0x569   :  { %2335 = vmatpush3.xpose.msk.msra.mxu1 %vm140_vm3, %v671_v35  ;;  %2336 = vmatprep.mubr.msk.f32.mxu1 %vm2570_vm4, %v2569_v6  ;;  %v2449_v29 = vpack.c.bf16 %v135_v28, %v134_v27 }
 0x56a   :  { %2344 = vmatprep.subr.mxu1 %v2569_v6  ;;  %2341 = vmatprep.mubr.msk.f32.mxu0 %vm2570_vm4, %v2569_v6 }
 0x56c   :  { %2337 = vmatmul.mubr.msk.f32.vlgmr.msra.gmra.mrb[6].mxu1 %vm140_vm3, %v669_v36 }
 0x56d   :  { %2346 = vmatprep.mubr.msk.f32.mxu1 %vm2570_vm4, %v2569_v6 }
 0x637   :  { %v513_v37 = vpop.f32.mrb[6].mxu0 }
 0x638   :  { %v2323_v38 = vpop.f32.mrb[7].mxu0 }
 0x63b   :  { %v586_v39 = vpop.f32.mrb[4].mxu1  ;;  %v664_v40 = vpop.f32.mrb[8].mxu0 }
 0x63c   :  { %v665_v41 = vadd.f32 %v664_v40, %v2708_v10  ;;  %v2328_v42 = vpop.f32.mrb[5].mxu1  ;;  %v2333_v43 = vpop.f32.mrb[9].mxu0 }
 0x63e   :  { %v746_v44 = vsel %vm421_vm6, %v665_v41, -inf }
 0x63f   :  { %747 = vmax.xlane.f32.xlu0 %v746_v44  ;;  %v742_v45 = vpop.f32.mrb[6].mxu1 }
 0x640   :  { %v743_v46 = vadd.f32 %v742_v45, %v2708_v10  ;;  %v2338_v47 = vpop.f32.mrb[7].mxu1 }
 0x642   :  { %v749_v48 = vsel %vm421_vm6, %v743_v46, -inf }
 0x643   :  { %750 = vmax.xlane.f32.xlu1 %v749_v48 }
 0x654   :  { %846 = vrot.lane.b32.xlu1 %v2690_v2, %s2574_s22 }
 0x6cc   :  { %v748_v49 = vpop.xlane.xlu0 %747 }
 0x6cd   :  { %v752_v50 = vsub.f32 %v665_v41, %v748_v49 }
 0x6cf   :  { %v754_v51 = vmul.f32 1.442695, %v752_v50 }
 0x6d0   :  { %v751_v52 = vpop.xlane.xlu1 %750 }
 0x6d1   :  { %2508 = vpow2.f32 %v754_v51  ;;  %v753_v54 = vsub.f32 %v743_v46, %v751_v52 }
 0x6d3   :  { %v756_v56 = vmul.f32 1.442695, %v753_v54 }
 0x6d4   :  { %v847_v57 = vpop.permute.xlu1 %846 }
 0x6d5   :  { %2510 = vpow2.f32 %v756_v56  ;;  %2345 = vmatpush3.msra.mxu1 %v847_v57  ;;  %v2205_v56 = vld [vmem:[%s2971_s1 + $0x83] ss:$0 sm:$0xff] }
 0x6db   :  { %v2509_v58 = vpop.eup %2508 }
 0x6dc   :  { %v758_v60 = vsel %vm421_vm6, %v2509_v58, 0.0 }
 0x6dd   :  { %759 = vadd.xlane.f32.xlu0 %v758_v60 }
 0x6df   :  { %v2511_v61 = vpop.eup %2510 }
 0x6e0   :  { %v761_v63 = vsel %vm421_vm6, %v2511_v61, 0.0 }
 0x6e1   :  { %762 = vadd.xlane.f32.xlu0 %v761_v63 }
 0x6f7   :  { %769 = vrot.lane.b32.xlu0 %v2687_v0, %s2574_s22  ;;  %v2204_v0 = vld [vmem:[%s2971_s1 + $0x82] ss:$0 sm:$0xff] }
 0x76a   :  { %v760_v1 = vpop.xlane.xlu0 %759 }
 0x76b   :  { %2512 = vrcp.f32 %v760_v1 }
 0x76e   :  { %v763_v2 = vpop.xlane.xlu0 %762 }
 0x76f   :  { %2514 = vrcp.f32 %v763_v2 }
 0x772   :  { %v770_v3 = vpop.permute.xlu0 %769 }
 0x773   :  { %2340 = vmatpush3.msra.mxu0 %v770_v3 }
 0x775   :  { %v2513_v4 = vpop.eup %2512 }
 0x776   :  { %v766_v5 = vmul.f32 %v2513_v4, %v2509_v58 }
 0x778   :  { %2342 = vmatmul.mubr.msk.f32.vlgmr.msra.gmra.mrb[10].mxu0 %vm421_vm6, %v766_v5 }
 0x779   :  { %v2515_v9 = vpop.eup %2514 }
 0x77a   :  { %v767_v11 = vmul.f32 %v2515_v9, %v2511_v61 }
 0x77c   :  { %2347 = vmatmul.mubr.msk.f32.vlgmr.msra.gmra.mrb[8].mxu1 %vm421_vm6, %v767_v11 }
 0x77d   :  { %1184 = vmatprep.mubr.f32.mxu1 %v2569_v6 }
 0x84b   :  { %v841_v12 = vpop.f32.mrb[10].mxu0 }
 0x84c   :  { %v922_v13 = vadd.f32 %v841_v12, %v513_v37  ;;  %v2343_v14 = vpop.f32.mrb[11].mxu0  ;;  %v2209_v12 = vld [vmem:[%s2972_s2 + $0x48] sm:$0xff] }
 0x84e   :  { %v924_v15 = vadd.f32 %v922_v13, %v2671_v59  ;;  %v2211_v13 = vld [vmem:[%s2972_s2 + $0x58] sm:$0xff] }
 0x84f   :  { %v918_v16 = vpop.f32.mrb[8].mxu1  ;;  %v2453_v14 = vpack.c.bf16 %v2211_v13, %v2209_v12 }
 0x850   :  { %v930_v17 = vadd.f32 %v2204_v0, %v924_v15  ;;  %v923_v18 = vadd.f32 %v918_v16, %v586_v39  ;;  %v2348_v7 = vpop.f32.mrb[9].mxu1  ;;  %v2210_v15 = vld [vmem:[%s2972_s2 + $0x50] sm:$0xff] }
 0x851   :  { %2454 = vmatprep.subr.bf16.mxu1 %v2453_v14  ;;  %v2212_v7 = vld [vmem:[%s2972_s2 + $0x60] sm:$0xff] }
 0x852   :  { %v925_v8 = vadd.f32 %v923_v18, %v2678_v62  ;;  %v932_v19 = vsel %vm140_vm3, %v930_v17, 0.0  ;;  %v940_v23 = vmul.f32 %v930_v17, %v930_v17  ;;  %v133_v62 = vld [vmem:[%s2971_s1 + $0x48] sm:$0xff]  ;;  %v2215_v18 = vld [vmem:[%s2972_s2 + $0x78] sm:$0xff] }
 0x853   :  { %933 = vadd.xlane.f32.xlu1 %v932_v19  ;;  %v2445_v26 = vpack.c.bf16 %v133_v62, %v132_v25  ;;  %v2214_v19 = vld [vmem:[%s2972_s2 + $0x70] sm:$0xff] }
 0x854   :  { %v931_v20 = vadd.f32 %v2204_v0, %v925_v8  ;;  %v942_v59 = vsel %vm140_vm3, %v940_v23, 0.0  ;;  %v2208_v0 = vld [vmem:[%s2972_s2 + $0x40] sm:$0xff] }
 0x855   :  { %2446 = vmatprep.subr.bf16.mxu0 %v2445_v26  ;;  %v2455_v16 = vpack.c.bf16 %v2210_v15, %v2208_v0 }
 0x856   :  { %v935_v21 = vsel %vm140_vm3, %v931_v20, 0.0  ;;  %v941_v22 = vmul.f32 %v931_v20, %v931_v20  ;;  %2448 = vmatpush3.bf16.msra.mxu0 %v2445_v26 }
 0x857   :  { %936 = vadd.xlane.f32.xlu0 %v935_v21  ;;  %2450 = vmatprep.subr.bf16.mxu0 %v2449_v29 }
 0x858   :  { %v945_v24 = vsel %vm140_vm3, %v941_v22, 0.0  ;;  %2456 = vmatpush1.bf16.msra.mxu1 %v2455_v16 }
 0x859   :  { %946 = vadd.xlane.f32.xlu1 %v945_v24 }
 0x85a   :  { %2452 = vmatpush3.bf16.msra.mxu0 %v2449_v29 }
 0x85b   :  { %943 = vadd.xlane.f32.xlu0 %v942_v59  ;;  %2360 = vmatprep.subr.mxu0 %v2569_v6 }
 0x8e0   :  { %v934_v30 = vpop.xlane.xlu1 %933 }
 0x8e1   :  { %v938_v32 = vmul.f32 0.03125, %v934_v30 }
 0x8e3   :  { %v950_v38 = vmul.f32 %v938_v32, %v938_v32  ;;  %v954_v46 = vsub.f32 %v930_v17, %v938_v32  ;;  %v2213_v17 = vld [vmem:[%s2972_s2 + $0x68] sm:$0xff] }
 0x8e4   :  { %v937_v31 = vpop.xlane.xlu0 %936  ;;  %v2457_v8 = vpack.c.bf16 %v2215_v18, %v2213_v17 }
 0x8e5   :  { %v939_v33 = vmul.f32 0.03125, %v937_v31 }
 0x8e6   :  { %v947_v34 = vpop.xlane.xlu1 %946  ;;  %2458 = vmatprep.subr.bf16.mxu1 %v2457_v8 }
 0x8e7   :  { %v951_v35 = vmul.f32 %v939_v33, %v939_v33  ;;  %v949_v36 = vmul.f32 0.03125, %v947_v34  ;;  %v955_v44 = vsub.f32 %v931_v20, %v939_v33  ;;  %v2459_v20 = vpack.c.bf16 %v2214_v19, %v2212_v7 }
 0x8e8   :  { %v944_v37 = vpop.xlane.xlu0 %943 }
 0x8e9   :  { %v953_v39 = vsub.f32 %v949_v36, %v951_v35  ;;  %v948_v40 = vmul.f32 0.03125, %v944_v37  ;;  %2460 = vmatpush1.bf16.msra.mxu1 %v2459_v20  ;;  %v2814_v35 = vld [vmem:[%s2971_s1 + $0x84] ss:$0 sm:$0xff]  ;;  %v2819_v37 = vld [vmem:[%s2971_s1 + $0x85] ss:$0 sm:$0xff] }
 0x8ea   :  { %2370 = vmatprep.subr.mxu1 %v2569_v6 }
 0x8eb   :  { %v957_v41 = vadd.f32 1e-05, %v953_v39  ;;  %v952_v42 = vsub.f32 %v948_v40, %v950_v38 }
 0x8ed   :  { %2516 = vrsqrt.f32 %v957_v41  ;;  %v956_v43 = vadd.f32 1e-05, %v952_v42 }
 0x8ef   :  { %2518 = vrsqrt.f32 %v956_v43 }
 0x8f7   :  { %v2517_v45 = vpop.eup %2516 }
 0x8f8   :  { %v961_v47 = vmul.f32 %v2517_v45, %v955_v44 }
 0x8f9   :  { %v2519_v48 = vpop.eup %2518 }
 0x8fa   :  { %v960_v49 = vmul.f32 %v2519_v48, %v954_v46  ;;  %v963_v50 = vmul.f32 %v2662_v53, %v961_v47 }
 0x8fc   :  { %v962_v51 = vmul.f32 %v2662_v53, %v960_v49  ;;  %v965_v54 = vadd.f32 %v2667_v55, %v963_v50 }
 0x8fe   :  { %v964_v52 = vadd.f32 %v2667_v55, %v962_v51 }
 0x900   :  { %2357 = vmatprep.mubr.msk.f32.mxu0 %vm140_vm3, %v964_v52 }
 0x901   :  { %2358 = vmatmul.mubr.msk.f32.vlgmr.msra.gmra.mrb[12].mxu0 %vm140_vm3, %v965_v54 }
 0x902   :  { %2362 = vmatprep.mubr.msk.f32.mxu0 %vm2570_vm4, %v2569_v6 }
 0x9d4   :  { %v2359_v57 = vpop.f32.mrb[12].mxu0 }
 0x9d5   :  { %v1048_v58 = vadd.f32 %v2359_v57, %v2205_v56  ;;  %v1042_v60 = vpop.f32.mrb[13].mxu0 }
 0x9d6   :  { %v1043_v61 = vadd.f32 %v2205_v56, %v1042_v60 }
 0x9d7   :  { %v1052_v53 = vmax.f32 %v1048_v58, 0.0 }
 0x9d8   :  { %v1051_v63 = vmax.f32 %v1043_v61, 0.0 }
 0x9d9   :  { %v1054_v1 = vadd.f32 %v1052_v53, %v965_v54 }
 0x9da   :  { %v1053_v2 = vadd.f32 %v1051_v63, %v964_v52 }
 0x9db   :  { %v1081_v5 = vmul.f32 %v1054_v1, %v1054_v1  ;;  %v1075_v9 = vsel %vm140_vm3, %v1054_v1, 0.0 }
 0x9dc   :  { %v1072_v55 = vsel %vm140_vm3, %v1053_v2, 0.0  ;;  %v1080_v3 = vmul.f32 %v1053_v2, %v1053_v2 }
 0x9dd   :  { %1073 = vadd.xlane.f32.xlu0 %v1072_v55  ;;  %v1085_v11 = vsel %vm140_vm3, %v1081_v5, 0.0 }
 0x9de   :  { %v1082_v4 = vsel %vm140_vm3, %v1080_v3, 0.0 }
 0x9df   :  { %1083 = vadd.xlane.f32.xlu1 %v1082_v4 }
 0x9e1   :  { %1076 = vadd.xlane.f32.xlu0 %v1075_v9 }
 0x9e3   :  { %1086 = vadd.xlane.f32.xlu1 %v1085_v11 }
 0xa6a   :  { %v1074_v21 = vpop.xlane.xlu0 %1073 }
 0xa6b   :  { %v1078_v22 = vmul.f32 0.03125, %v1074_v21 }
 0xa6c   :  { %v1084_v23 = vpop.xlane.xlu1 %1083 }
 0xa6d   :  { %v1090_v24 = vmul.f32 %v1078_v22, %v1078_v22  ;;  %v1088_v59 = vmul.f32 0.03125, %v1084_v23  ;;  %v1094_v33 = vsub.f32 %v1053_v2, %v1078_v22 }
 0xa6e   :  { %v1077_v25 = vpop.xlane.xlu0 %1076 }
 0xa6f   :  { %v1092_v62 = vsub.f32 %v1088_v59, %v1090_v24  ;;  %v1079_v26 = vmul.f32 0.03125, %v1077_v25 }
 0xa70   :  { %v1087_v27 = vpop.xlane.xlu1 %1086 }
 0xa71   :  { %v1096_v28 = vadd.f32 1e-05, %v1092_v62  ;;  %v1091_v29 = vmul.f32 %v1079_v26, %v1079_v26  ;;  %v1089_v30 = vmul.f32 0.03125, %v1087_v27  ;;  %v1095_v38 = vsub.f32 %v1054_v1, %v1079_v26 }
 0xa73   :  { %2520 = vrsqrt.f32 %v1096_v28  ;;  %v1093_v31 = vsub.f32 %v1089_v30, %v1091_v29 }
 0xa75   :  { %v1097_v32 = vadd.f32 1e-05, %v1093_v31 }
 0xa77   :  { %2522 = vrsqrt.f32 %v1097_v32 }
 0xa7d   :  { %v2521_v34 = vpop.eup %2520 }
 0xa7e   :  { %v1100_v36 = vmul.f32 %v2521_v34, %v1094_v33 }
 0xa80   :  { %v1106_v39 = vmul.f32 %v2814_v35, %v1100_v36 }
 0xa81   :  { %v2523_v40 = vpop.eup %2522 }
 0xa82   :  { %v2823_v41 = vadd.f32 %v2819_v37, %v1106_v39  ;;  %v1101_v42 = vmul.f32 %v2523_v40, %v1095_v38 }
 0xa84   :  { %2218 = vmatmul.mubr.msk.f32.vlgmr.msra.gmra.mrb[10].mxu1 %vm140_vm3, %v2823_v41  ;;  %v1107_v43 = vmul.f32 %v2814_v35, %v1101_v42 }
 0xa85   :  { %1190 = vmatprep.mubr.f32.mxu1 %v2569_v6 }
 0xa86   :  { %v2830_v44 = vadd.f32 %v2819_v37, %v1107_v43 }
 0xa88   :  { %2219 = vmatmul.mubr.msk.f32.gmra.mrb[12].mxu1 %vm140_vm3, %v2830_v44 }
 0xa89   :  { %2372 = vmatprep.mubr.msk.f32.mxu1 %vm2570_vm4, %v2569_v6 }
 0xb57   :  { %v1186_v45 = vpop.f32.mrb[10].mxu1 }
 0xb58   :  { %1198 = vrot.lane.b32.xlu0 %v1186_v45, %s2571_s20  ;;  %v2837_v46 = vpop.f32.mrb[11].mxu1 }
 0xb59   :  { %2371 = vmatpush3.msra.mxu1 %v2837_v46 }
 0xb5a   :  { %2380 = vmatprep.subr.mxu1 %v2569_v6 }
 0xb5b   :  { %v1192_v47 = vpop.f32.mrb[12].mxu1 }
 0xb5c   :  { %1275 = vrot.lane.b32.xlu1 %v1192_v47, %s2571_s20  ;;  %v2842_v48 = vpop.f32.mrb[13].mxu1 }
 0xbca   :  { %v1199_v49 = vpop.permute.xlu0 %1198 }
 0xbcb   :  { %2361 = vmatpush3.xpose.msk.msra.mxu0 %vm140_vm3, %v1199_v49 }
 0xbcc   :  { %2365 = vmatprep.subr.mxu0 %v2569_v6 }
 0xbce   :  { %2363 = vmatmul.mubr.msk.f32.vlgmr.msra.gmra.mrb[14].mxu0 %vm140_vm3, %v1186_v45  ;;  %v1276_v50 = vpop.permute.xlu1 %1275 }
 0xbcf   :  { %2366 = vmatpush3.xpose.msk.msra.mxu0 %vm140_vm3, %v1276_v50  ;;  %2367 = vmatprep.mubr.msk.f32.mxu0 %vm2570_vm4, %v2569_v6 }
 0xbd0   :  { %2375 = vmatprep.subr.mxu0 %v2569_v6 }
 0xbd2   :  { %2368 = vmatmul.mubr.msk.f32.vlgmr.msra.gmra.mrb[16].mxu0 %vm140_vm3, %v1192_v47 }
 0xbd3   :  { %2376 = vmatpush3.msra.mxu0 %v2842_v48  ;;  %2377 = vmatprep.mubr.msk.f32.mxu0 %vm2570_vm4, %v2569_v6 }
 0xbd4   :  { %2385 = vmatprep.subr.mxu0 %v2569_v6 }
 0xca1   :  { %v1270_v51 = vpop.f32.mrb[14].mxu0 }
 0xca2   :  { %v1271_v52 = vadd.f32 %v1270_v51, %v2708_v10  ;;  %v2364_v54 = vpop.f32.mrb[15].mxu0 }
 0xca4   :  { %v1351_v56 = vsel %vm421_vm6, %v1271_v52, -inf }
 0xca5   :  { %1352 = vmax.xlane.f32.xlu1 %v1351_v56  ;;  %v1347_v57 = vpop.f32.mrb[16].mxu0 }
 0xca6   :  { %v1348_v58 = vadd.f32 %v1347_v57, %v2708_v10  ;;  %v2369_v60 = vpop.f32.mrb[17].mxu0 }
 0xca8   :  { %v1354_v61 = vsel %vm421_vm6, %v1348_v58, -inf }
 0xca9   :  { %1355 = vmax.xlane.f32.xlu0 %v1354_v61 }
 0xcb6   :  { %1599 = vrot.lane.b32.xlu1 %v1192_v47, %s2573_s21 }
 0xd32   :  { %v1353_v53 = vpop.xlane.xlu1 %1352 }
 0xd33   :  { %v1357_v63 = vsub.f32 %v1271_v52, %v1353_v53 }
 0xd35   :  { %v1359_v1 = vmul.f32 1.442695, %v1357_v63 }
 0xd36   :  { %v1356_v2 = vpop.xlane.xlu0 %1355  ;;  %v1600_v12 = vpop.permute.xlu1 %1599 }
 0xd37   :  { %2524 = vpow2.f32 %v1359_v1  ;;  %v1358_v55 = vsub.f32 %v1348_v58, %v1356_v2 }
 0xd39   :  { %v1361_v3 = vmul.f32 1.442695, %v1358_v55 }
 0xd3b   :  { %2526 = vpow2.f32 %v1361_v3 }
 0xd41   :  { %v2525_v4 = vpop.eup %2524 }
 0xd42   :  { %v1363_v5 = vsel %vm421_vm6, %v2525_v4, 0.0 }
 0xd43   :  { %1364 = vadd.xlane.f32.xlu0 %v1363_v5 }
 0xd45   :  { %v2527_v9 = vpop.eup %2526 }
 0xd46   :  { %v1366_v11 = vsel %vm421_vm6, %v2527_v9, 0.0 }
 0xd47   :  { %1367 = vadd.xlane.f32.xlu1 %v1366_v11  ;;  %v1067_v11 = vld [vmem:[%s2971_s1 + $0x78] sm:$0xff] }
 0xd58   :  { %1519 = vrot.lane.b32.xlu1 %v1186_v45, %s2574_s22 }
 0xd59   :  { %1521 = vrot.lane.b32.xlu0 %v1186_v45, %s2573_s21 }
 0xd5d   :  { %1597 = vrot.lane.b32.xlu0 %v1192_v47, %s2574_s22 }
 0xdd0   :  { %v1365_v13 = vpop.xlane.xlu0 %1364 }
 0xdd1   :  { %2528 = vrcp.f32 %v1365_v13 }
 0xdd4   :  { %v1368_v14 = vpop.xlane.xlu1 %1367  ;;  %v1522_v16 = vpop.permute.xlu0 %1521 }
 0xdd5   :  { %2530 = vrcp.f32 %v1368_v14 }
 0xdd8   :  { %v1520_v7 = vpop.permute.xlu1 %1519  ;;  %v1598_v8 = vpop.permute.xlu0 %1597 }
 0xddb   :  { %v2529_v0 = vpop.eup %2528 }
 0xddc   :  { %v1371_v15 = vmul.f32 %v2529_v0, %v2525_v4  ;;  %v1064_v4 = vld [vmem:[%s2971_s1 + $0x60] sm:$0xff] }
 0xdde   :  { %2373 = vmatmul.mubr.msk.f32.vlgmr.msra.gmra.mrb[14].mxu1 %vm421_vm6, %v1371_v15 }
 0xddf   :  { %v2531_v17 = vpop.eup %2530  ;;  %2381 = vmatpush3.xpose.msk.msra.mxu1 %vm140_vm3, %v1522_v16  ;;  %2382 = vmatprep.mubr.msk.f32.mxu1 %vm2570_vm4, %v2569_v6 }
 0xde0   :  { %v1372_v18 = vmul.f32 %v2531_v17, %v2527_v9  ;;  %2390 = vmatprep.subr.mxu1 %v2569_v6  ;;  %v1066_v9 = vld [vmem:[%s2971_s1 + $0x70] sm:$0xff] }
 0xde2   :  { %2378 = vmatmul.mubr.msk.f32.vlgmr.msra.gmra.mrb[18].mxu0 %vm421_vm6, %v1372_v18  ;;  %2383 = vmatmul.mubr.msk.f32.vlgmr.msra.gmra.mrb[16].mxu1 %vm140_vm3, %v1520_v7 }
 0xde3   :  { %2386 = vmatpush3.xpose.msk.msra.mxu0 %vm140_vm3, %v1600_v12  ;;  %2387 = vmatprep.mubr.msk.f32.mxu0 %vm2570_vm4, %v2569_v6  ;;  %v2465_v12 = vpack.c.bf16 %v1067_v11, %v1066_v9 }
 0xde4   :  { %2395 = vmatprep.subr.mxu0 %v2569_v6  ;;  %2392 = vmatprep.mubr.msk.f32.mxu1 %vm2570_vm4, %v2569_v6 }
 0xde6   :  { %2388 = vmatmul.mubr.msk.f32.vlgmr.msra.gmra.mrb[20].mxu0 %vm140_vm3, %v1598_v8 }
 0xde7   :  { %2397 = vmatprep.mubr.msk.f32.mxu0 %vm2570_vm4, %v2569_v6 }
 0xeb1   :  { %v1442_v19 = vpop.f32.mrb[14].mxu1 }
 0xeb2   :  { %v2374_v20 = vpop.f32.mrb[15].mxu1 }
 0xeb5   :  { %v1515_v21 = vpop.f32.mrb[18].mxu0  ;;  %v1593_v22 = vpop.f32.mrb[16].mxu1 }
 0xeb6   :  { %v1594_v23 = vadd.f32 %v1593_v22, %v2708_v10  ;;  %v2379_v24 = vpop.f32.mrb[19].mxu0  ;;  %v2384_v59 = vpop.f32.mrb[17].mxu1 }
 0xeb8   :  { %v1675_v25 = vsel %vm421_vm6, %v1594_v23, -inf }
 0xeb9   :  { %v1671_v62 = vpop.f32.mrb[20].mxu0  ;;  %1676 = vmax.xlane.f32.xlu1 %v1675_v25 }
 0xeba   :  { %v1672_v26 = vadd.f32 %v1671_v62, %v2708_v10  ;;  %v2389_v27 = vpop.f32.mrb[21].mxu0 }
 0xebc   :  { %v1678_v28 = vsel %vm421_vm6, %v1672_v26, -inf }
 0xebd   :  { %1679 = vmax.xlane.f32.xlu0 %v1678_v28 }
 0xf46   :  { %v1677_v29 = vpop.xlane.xlu1 %1676 }
 0xf47   :  { %v1681_v6 = vsub.f32 %v1594_v23, %v1677_v29 }
 0xf49   :  { %v1683_v30 = vmul.f32 1.442695, %v1681_v6 }
 0xf4a   :  { %v1680_v31 = vpop.xlane.xlu0 %1679 }
 0xf4b   :  { %2532 = vpow2.f32 %v1683_v30  ;;  %v1682_v32 = vsub.f32 %v1672_v26, %v1680_v31  ;;  %v1984_v31 = vld [vmem:[%s2971_s1 + $0x20] sm:$0xff] }
 0xf4d   :  { %v1685_v33 = vmul.f32 1.442695, %v1682_v32  ;;  %v1985_v32 = vld [vmem:[%s2971_s1 + $0x28] sm:$0xff] }
 0xf4f   :  { %2534 = vpow2.f32 %v1685_v33  ;;  %v2469_v33 = vpack.c.bf16 %v1985_v32, %v1984_v31 }
 0xf55   :  { %v2533_v34 = vpop.eup %2532 }
 0xf56   :  { %v1687_v36 = vsel %vm421_vm6, %v2533_v34, 0.0 }
 0xf57   :  { %1688 = vadd.xlane.f32.xlu0 %v1687_v36  ;;  %v1989_v36 = vld [vmem:[%s2973_s3] sm:$0xff] }
 0xf59   :  { %v2535_v38 = vpop.eup %2534 }
 0xf5a   :  { %v1690_v39 = vsel %vm421_vm6, %v2535_v38, 0.0 }
 0xf5b   :  { %1691 = vadd.xlane.f32.xlu1 %v1690_v39 }
 0xf6c   :  { %1775 = vrot.lane.b32.xlu1 %v2842_v48, %s2574_s22 }
 0xf6d   :  { %1698 = vrot.lane.b32.xlu0 %v2837_v46, %s2574_s22  ;;  %v2232_v46 = vld [vmem:[%s2971_s1 + $0x86] ss:$0 sm:$0xff] }
 0xfe4   :  { %v1689_v10 = vpop.xlane.xlu0 %1688 }
 0xfe5   :  { %2536 = vrcp.f32 %v1689_v10  ;;  %v2233_v10 = vld [vmem:[%s2971_s1 + $0x87] ss:$0 sm:$0xff] }
 0xfe8   :  { %v1699_v40 = vpop.permute.xlu0 %1698  ;;  %v1692_v42 = vpop.xlane.xlu1 %1691 }
 0xfe9   :  { %2538 = vrcp.f32 %v1692_v42  ;;  %2391 = vmatpush3.msra.mxu1 %v1699_v40 }
 0xfec   :  { %v1776_v43 = vpop.permute.xlu1 %1775 }
 0xfed   :  { %2396 = vmatpush3.msra.mxu0 %v1776_v43 }
 0xfee   :  { %2470 = vmatprep.subr.bf16.mxu0 %v2469_v33 }
 0xfef   :  { %v2537_v45 = vpop.eup %2536 }
 0xff0   :  { %v1695_v47 = vmul.f32 %v2537_v45, %v2533_v34 }
 0xff2   :  { %2393 = vmatmul.mubr.msk.f32.vlgmr.msra.gmra.mrb[18].mxu1 %vm421_vm6, %v1695_v47 }
 0xff3   :  { %v2539_v49 = vpop.eup %2538 }
 0xff4   :  { %v1696_v50 = vmul.f32 %v2539_v49, %v2535_v38  ;;  %v1990_v38 = vld [vmem:[%s2973_s3 + $0x8] sm:$0xff] }
 0xff5   :  { %v2477_v39 = vpack.c.bf16 %v1990_v38, %v1989_v36 }
 0xff6   :  { %2398 = vmatmul.mubr.msk.f32.vlgmr.msra.gmra.mrb[22].mxu0 %vm421_vm6, %v1696_v50 }
 0xff7   :  { %2472 = vmatpush3.bf16.msra.mxu0 %v2469_v33 }
0x10c5   :  { %v1770_v48 = vpop.f32.mrb[18].mxu1 }
0x10c6   :  { %v1851_v51 = vadd.f32 %v1770_v48, %v1442_v19  ;;  %v2394_v52 = vpop.f32.mrb[19].mxu1 }
0x10c7   :  { %v1992_v52 = vld [vmem:[%s2973_s3 + $0x18] sm:$0xff] }
0x10c8   :  { %v1853_v54 = vadd.f32 %v1851_v51, %v2823_v41  ;;  %v1991_v51 = vld [vmem:[%s2973_s3 + $0x10] sm:$0xff] }
0x10c9   :  { %v1847_v56 = vpop.f32.mrb[22].mxu0 }
0x10ca   :  { %v1859_v57 = vadd.f32 %v2232_v46, %v1853_v54  ;;  %v1852_v58 = vadd.f32 %v1847_v56, %v1515_v21  ;;  %v2399_v60 = vpop.f32.mrb[23].mxu0  ;;  %v2236_v54 = vld [vmem:[%s2971_s1 + $0x88] ss:$0 sm:$0xff] }
0x10cc   :  { %v1854_v61 = vadd.f32 %v1852_v58, %v2830_v44  ;;  %v1861_v53 = vsel %vm140_vm3, %v1859_v57, 0.0  ;;  %v1869_v55 = vmul.f32 %v1859_v57, %v1859_v57  ;;  %v1065_v44 = vld [vmem:[%s2971_s1 + $0x68] sm:$0xff] }
0x10cd   :  { %1862 = vadd.xlane.f32.xlu1 %v1861_v53  ;;  %v2461_v5 = vpack.c.bf16 %v1065_v44, %v1064_v4 }
0x10ce   :  { %v1860_v63 = vadd.f32 %v2232_v46, %v1854_v61  ;;  %v1871_v41 = vsel %vm140_vm3, %v1869_v55, 0.0  ;;  %v2481_v46 = vpack.c.bf16 %v1992_v52, %v1991_v51 }
0x10cf   :  { %2462 = vmatprep.subr.bf16.mxu1 %v2461_v5 }
0x10d0   :  { %v1864_v1 = vsel %vm140_vm3, %v1860_v63, 0.0  ;;  %v1870_v2 = vmul.f32 %v1860_v63, %v1860_v63  ;;  %2464 = vmatpush3.bf16.msra.mxu1 %v2461_v5 }
0x10d1   :  { %1865 = vadd.xlane.f32.xlu0 %v1864_v1  ;;  %2466 = vmatprep.subr.bf16.mxu1 %v2465_v12 }
0x10d2   :  { %v1874_v3 = vsel %vm140_vm3, %v1870_v2, 0.0 }
0x10d3   :  { %1875 = vadd.xlane.f32.xlu1 %v1874_v3 }
0x10d4   :  { %2468 = vmatpush3.bf16.msra.mxu1 %v2465_v12 }
0x10d5   :  { %1872 = vadd.xlane.f32.xlu0 %v1871_v41  ;;  %2478 = vmatprep.subr.bf16.mxu1 %v2477_v39 }
0x115a   :  { %v1863_v13 = vpop.xlane.xlu1 %1862 }
0x115b   :  { %v1867_v0 = vmul.f32 0.03125, %v1863_v13 }
0x115d   :  { %v1879_v8 = vmul.f32 %v1867_v0, %v1867_v0  ;;  %v1883_v25 = vsub.f32 %v1859_v57, %v1867_v0 }
0x115e   :  { %v1866_v14 = vpop.xlane.xlu0 %1865 }
0x115f   :  { %v1868_v15 = vmul.f32 0.03125, %v1866_v14 }
0x1160   :  { %v1876_v16 = vpop.xlane.xlu1 %1875 }
0x1161   :  { %v1880_v17 = vmul.f32 %v1868_v15, %v1868_v15  ;;  %v1878_v18 = vmul.f32 0.03125, %v1876_v16  ;;  %v1884_v24 = vsub.f32 %v1860_v63, %v1868_v15  ;;  %v2239_v63 = vld [vmem:[%s2973_s3 + $0x20] ss:$0 sm:$0xff] }
0x1162   :  { %v1873_v7 = vpop.xlane.xlu0 %1872 }
0x1163   :  { %v1882_v19 = vsub.f32 %v1878_v18, %v1880_v17  ;;  %v1877_v20 = vmul.f32 0.03125, %v1873_v7 }
0x1165   :  { %v1886_v21 = vadd.f32 1e-05, %v1882_v19  ;;  %v1881_v22 = vsub.f32 %v1877_v20, %v1879_v8 }
0x1167   :  { %2540 = vrsqrt.f32 %v1886_v21  ;;  %v1885_v23 = vadd.f32 1e-05, %v1881_v22 }
0x1169   :  { %2542 = vrsqrt.f32 %v1885_v23 }
0x1171   :  { %v2541_v59 = vpop.eup %2540 }
0x1172   :  { %v1890_v62 = vmul.f32 %v2541_v59, %v1884_v24 }
0x1173   :  { %v2543_v26 = vpop.eup %2542 }
0x1174   :  { %v1889_v27 = vmul.f32 %v2543_v26, %v1883_v25  ;;  %v1892_v28 = vmul.f32 %v2814_v35, %v1890_v62 }
0x1176   :  { %v1891_v29 = vmul.f32 %v2814_v35, %v1889_v27  ;;  %v1894_v30 = vadd.f32 %v2819_v37, %v1892_v28  ;;  %v1986_v35 = vld [vmem:[%s2971_s1 + $0x30] sm:$0xff] }
0x1178   :  { %v1893_v6 = vadd.f32 %v2819_v37, %v1891_v29  ;;  %v1987_v37 = vld [vmem:[%s2971_s1 + $0x38] sm:$0xff]  ;;  %s2544_s1 = scalar_lea.vmem %s2174_s5, 256 }
0x1179   :  { %v2473_v34 = vpack.c.bf16 %v1987_v37, %v1986_v35  ;;  %p2545_p0 = scmp.ne.s32.totalorder %s2174_s5, %s2544_s1  ;;  %p2550_p2 = scmp.lt.s32.totalorder %s2544_s1, %s2544_s1 }
0x117a   :  { %2408 = vmatprep.mubr.msk.f32.mxu1 %vm140_vm3, %v1893_v6 }
0x117b   :  { %2409 = vmatmul.mubr.msk.f32.vlgmr.msra.gmra.mrb[20].mxu1 %vm140_vm3, %v1894_v30  ;;  %2474 = vmatprep.subr.bf16.mxu0 %v2473_v34  ;;  %p2551_p3 = por %p2550_p2, %p2549_p1 }
0x117c   :  { %2476 = vmatpush3.bf16.msra.mxu0 %v2473_v34  ;;  %2480 = vmatpush3.bf16.msra.mxu1 %v2477_v39 }
0x117d   :  { %2482 = vmatprep.subr.bf16.mxu1 %v2481_v46  ;;  %p2552_p4 = pnand %p2551_p3, %p2545_p0 }
0x1180   :  { %2484 = vmatpush3.bf16.msra.mxu1 %v2481_v46 }
0x124e   :  { %v2410_v40 = vpop.f32.mrb[20].mxu1 }
0x124f   :  { %v1977_v42 = vadd.f32 %v2410_v40, %v2233_v10  ;;  %v1971_v43 = vpop.f32.mrb[21].mxu1 }
0x1250   :  { %v1972_v45 = vadd.f32 %v2233_v10, %v1971_v43 }
0x1251   :  { %v1981_v47 = vmax.f32 %v1977_v42, 0.0 }
0x1252   :  { %v1980_v49 = vmax.f32 %v1972_v45, 0.0 }
0x1253   :  { %v1983_v48 = vadd.f32 %v1981_v47, %v1894_v30 }
0x1254   :  { %v1982_v50 = vadd.f32 %v1980_v49, %v1893_v6 }
0x1256   :  { %2419 = vmatprep.mubr.msk.f32.mxu0 %vm140_vm3, %v1982_v50 }
0x1257   :  { %2420 = vmatmul.mubr.msk.f32.vlgmr.msra.gmra.mrb[24].mxu0 %vm140_vm3, %v1983_v48 }
0x132a   :  { %v2421_v56 = vpop.f32.mrb[24].mxu0 }
0x132b   :  { %v2076_v57 = vadd.f32 %v2421_v56, %v2236_v54  ;;  %v2070_v58 = vpop.f32.mrb[25].mxu0 }
0x132c   :  { %v2071_v60 = vadd.f32 %v2236_v54, %v2070_v58 }
0x132d   :  { %v2080_v53 = vmax.f32 %v2076_v57, 0.0 }
0x132e   :  { %v2079_v61 = vmax.f32 %v2071_v60, 0.0 }
0x1330   :  { %2430 = vmatprep.mubr.msk.f32.mxu1 %vm140_vm3, %v2079_v61 }
0x1331   :  { %2431 = vmatmul.mubr.msk.f32.vlgmr.msra.gmra.mrb[22].mxu1 %vm140_vm3, %v2080_v53 }
0x1404   :  { %v2432_v1 = vpop.f32.mrb[22].mxu1 }
0x1405   :  { %v2163_v2 = vadd.f32 %v2432_v1, %v2239_v63  ;;  %v2157_v55 = vpop.f32.mrb[23].mxu1 }
0x1406   :  { %v2158_v3 = vadd.f32 %v2239_v63, %v2157_v55 }
0x1407   :  { %2167 = vst [vmem:[#allocation2 + $0x8] sm:$0xff] %v2163_v2 }
0x1408   :  { %2166 = vst [vmem:[#allocation2] sm:$0xff] %v2158_v3 }
0x1409   :  { %2555 = shalt.err (!%p2552_p4)
}
0x140a   :  { %s2556_s3 = scalar_lea.hbm %s2974_s4, 256 }
0x140b   :  { %p2557_p5 = scmp.ne.s32.totalorder %s2974_s4, %s2556_s3  ;;  %p2560_p6 = scmp.lt.u32.totalorder %s2556_s3, %s2974_s4 }
0x140d   :  { %p2562_p7 = pnand %p2560_p6, %p2557_p5 }
0x140f   :  { %2565 = shalt.err (!%p2562_p7)
}
0x1410   :  { %s2576_s12 = smov 128   ;;  %s2577_s13 = smov 8  }
0x1411   :  { %2179 = dma.vmem_to_hbm [thread:$0]  %s2174_s5, 256, %s2974_s4, [#allocation3], %s2576_s12, %s2576_s12, %s2577_s13  }
0x1412   :  { %2566 = dma.done.wait [#allocation3], 256  }
0x1413   :  { %2567 = vsyncadd [#allocation3], 4294967040 }
0x1414   :  { %2183 = vsyncpa [#allocation3], 1 }

</bundles_post_ra>
